<compile_context>
chip_gen: v5e
topology: v5e:2x2
jax: 0.10.0
libtpu: 0.0.40
codegen_flags: <defaults>
</compile_context>

<pallas_src>
import functools
import math

import jax
import jax.numpy as jnp
from jax import lax
from jax.experimental import pallas as pl
from jax.experimental.pallas import tpu as pltpu


STACKED_PARAMS = ("wqkv", "bqkv", "wo", "bo",
                  "ln1w", "ln1b", "w1", "b1", "w2", "b2",
                  "ln2w", "ln2b")
# weights that feed the MXU -> cast to bf16; biases / LN params stay f32
BF16_PARAMS = frozenset({"wqkv", "wo", "w1", "w2"})


def _cdiv(a, b):
    return -(-a // b)


def _round_up(x, m):
    return ((x + m - 1) // m) * m


def _layer_norm(y, w, b, eps):
    mu = jnp.mean(y, axis=-1, keepdims=True)
    var = jnp.mean((y - mu) ** 2, axis=-1, keepdims=True)
    return (y - mu) * lax.rsqrt(var + eps) * w + b


# --------------------------------------------------------------------------
# Kernel: one encoder layer (grid axis 1) for one slab of TN positions
# (grid axis 0).  The activation is carried across the layer axis in a VMEM
# scratch; the vocab head runs on the last layer step only.
# --------------------------------------------------------------------------
def _encoder_kernel(x_ref, pos_ref,
                    wqkv_ref, bqkv_ref, wo_ref, bo_ref,
                    ln1w_ref, ln1b_ref, w1_ref, b1_ref,
                    w2_ref, b2_ref, ln2w_ref, ln2b_ref,
                    wout_ref, bout_ref,
                    o_ref,
                    act_ref, attn_ref,
                    *, nhead, eps):
    layer = pl.program_id(1)
    num_layers = pl.num_programs(1)
    B, TN, E = x_ref.shape                  # B == PyTorch sequence axis (small)
    R = B * TN
    hd = E // nhead
    scale = 1.0 / math.sqrt(hd)
    V_pad = o_ref.shape[2]

    # ---- init the carried activation at the first layer of every S tile ----
    @pl.when(layer == 0)
    def _():
        # embedding slab + positional encoding (f32), flattened to (R, E)
        act_ref[...] = (x_ref[...] + pos_ref[...]).reshape(R, E)

    xf = act_ref[...]                                            # (R, E) f32

    # ---- QKV projection: one big bf16 matmul, f32 accumulation ----
    qkv = jnp.dot(xf.astype(jnp.bfloat16), wqkv_ref[...],
                  preferred_element_type=jnp.float32) + bqkv_ref[...]
    q = qkv[:, 0:E] * scale
    k = qkv[:, E:2 * E]
    v = qkv[:, 2 * E:3 * E]
    # cheap leading-dim split (last dim / lane layout untouched)
    q3 = q.reshape(B, TN, E)
    k3 = k.reshape(B, TN, E)
    v3 = v.reshape(B, TN, E)

    # ---- multi-head self-attention over the B rows, per position ----
    # Pure VPU/XLU: per-head lane slices, cross-lane sums, elementwise softmax.
    # No tiny MXU matmuls (perf review item 1).  B and nhead are small, so the
    # static unroll stays bounded.
    for li in range(B):
        for h in range(nhead):
            sl = slice(h * hd, (h + 1) * hd)
            q_h = q3[li][:, sl]                                   # (TN, hd)
            s_list = [jnp.sum(q_h * k3[mi][:, sl], axis=-1, keepdims=True)
                      for mi in range(B)]                         # each (TN, 1)
            s_max = functools.reduce(jnp.maximum, s_list)
            e_list = [jnp.exp(s - s_max) for s in s_list]
            denom = functools.reduce(jnp.add, e_list)
            inv = pl.reciprocal(denom, approx=False)              # exact
            o_h = e_list[0] * inv * v3[0][:, sl]
            for mi in range(1, B):
                o_h = o_h + e_list[mi] * inv * v3[mi][:, sl]
            # write into the preallocated scratch (no concatenate relayout)
            attn_ref[li, :, sl] = o_h

    attn = attn_ref[...].reshape(R, E)

    # ---- attention output projection (single (R,E)@(E,E) bf16 matmul) ----
    attn = jnp.dot(attn.astype(jnp.bfloat16), wo_ref[...],
                   preferred_element_type=jnp.float32) + bo_ref[...]

    # ---- residual + LayerNorm1 (f32) ----
    y = _layer_norm(xf + attn, ln1w_ref[...], ln1b_ref[...], eps)

    # ---- feed forward (relu), bf16 matmuls / f32 accumulation ----
    h1 = jnp.maximum(
        jnp.dot(y.astype(jnp.bfloat16), w1_ref[...],
                preferred_element_type=jnp.float32) + b1_ref[...], 0.0)
    ff = jnp.dot(h1.astype(jnp.bfloat16), w2_ref[...],
                 preferred_element_type=jnp.float32) + b2_ref[...]

    # ---- residual + LayerNorm2 (f32); carry to the next layer step ----
    x_new = _layer_norm(y + ff, ln2w_ref[...], ln2b_ref[...], eps)
    act_ref[...] = x_new

    # ---- output head on the last layer step: lane-dense (vocab padded) ----
    @pl.when(layer == num_layers - 1)
    def _():
        logits = jnp.dot(x_new.astype(jnp.bfloat16), wout_ref[...],
                         preferred_element_type=jnp.float32) + bout_ref[...]
        o_ref[...] = logits.reshape(B, TN, V_pad)


# --------------------------------------------------------------------------
# One-time parameter preprocessing (hoisted out of the forward; cache this)
# --------------------------------------------------------------------------
def prepare_params(params):
    E = params["embedding"].shape[1]
    V = params["out_w"].shape[1]
    V_pad = _round_up(V, 128)
    stacked = {}
    for name in STACKED_PARAMS:
        arr = jnp.stack([lp[name] for lp in params["layers"]], axis=0)
        if name in BF16_PARAMS:
            arr = arr.astype(jnp.bfloat16)
        stacked[name] = arr
    return {
        "embedding": params["embedding"],
        "pos": params["pos"],
        "stacked": stacked,
        "wout": jnp.pad(params["out_w"],
                        ((0, 0), (0, V_pad - V))).astype(jnp.bfloat16),
        "bout": jnp.pad(params["out_b"], ((0, 0), (0, V_pad - V))),
        "emb_dim": E,
        "vocab_out": V,
        "num_layers": len(params["layers"]),
    }


# --------------------------------------------------------------------------
# Forward wrapper
# --------------------------------------------------------------------------
def transformer_forward(token_ids, prepped, *, nhead, seq_tile=None):
    B, S = token_ids.shape
    E = prepped["emb_dim"]
    num_layers = prepped["num_layers"]
    V = prepped["vocab_out"]
    wout, bout = prepped["wout"], prepped["bout"]
    V_pad = wout.shape[1]
    H = prepped["stacked"]["w1"].shape[2]
    assert E % nhead == 0
    assert prepped["pos"].shape[1] >= S

    # Balanced S tiling: minimise padded positions instead of snapping to 128
    # (perf review: e.g. S=150 -> 2 tiles of 80 instead of 2 tiles of 128).
    # On v6e with very long S, pass seq_tile=256/512 to amortise per-step
    # overhead; on v7x prefer an even tile count for the megacore split.
    if seq_tile is None:
        num_tiles = max(1, _cdiv(S, 128))
        TN = _round_up(_cdiv(S, num_tiles), 8)
    else:
        TN = _round_up(seq_tile, 8)
        num_tiles = _cdiv(S, TN)
    S_pad = num_tiles * TN
    R = B * TN

    # embedding gather + S padding (wrapper glue; not the hot path)
    x = jnp.take(prepped["embedding"], token_ids, axis=0)        # (B, S, E) f32
    x = jnp.pad(x, ((0, 0), (0, S_pad - S), (0, 0)))
    pos = jnp.pad(prepped["pos"][:, :S, :],
                  ((0, 0), (0, S_pad - S), (0, 0)))              # (1, S_pad, E)

    stacked = [prepped["stacked"][name] for name in STACKED_PARAMS]

    grid = (num_tiles, num_layers)
    act_map = lambda n, l: (0, n, 0)

    def layer_spec(arr):
        # per-layer slice streamed from HBM each layer step; leading dim squeezed
        return pl.BlockSpec((None,) + tuple(arr.shape[1:]),
                            lambda n, l: (l, 0, 0))

    def const_spec(arr):
        # grid-invariant (tiny) vocab-head params: DMA'd once, stay resident
        return pl.BlockSpec(tuple(arr.shape), lambda n, l: (0,) * arr.ndim)

    in_specs = [pl.BlockSpec((B, TN, E), act_map),               # x
                pl.BlockSpec((1, TN, E), act_map)]               # pos
    in_specs += [layer_spec(a) for a in stacked]                 # layer params
    in_specs += [const_spec(wout), const_spec(bout)]
    out_specs = pl.BlockSpec((B, TN, V_pad), act_map)

    # --- VMEM budget + cost hints (perf review) ---
    lw_bytes = sum(int(a.size) * a.dtype.itemsize for a in stacked)
    per_layer_bytes = lw_bytes // max(1, num_layers)
    vmem_need = (2 * per_layer_bytes                               # dbl-buffered layer weights
                 + int(wout.size) * 2 + int(bout.size) * 4         # resident head
                 + 2 * 4 * (B * TN * E + TN * E)                   # x, pos blocks
                 + 2 * 4 * B * TN * V_pad                          # output block
                 + 4 * (R * E + B * TN * E)                        # scratch
                 + 4 * R * (3 * E + H + 6 * E))                    # f32 temporaries
    vmem_limit = int(min(max(2 * vmem_need, 16 << 20), 64 << 20))

    flops = (2 * R * (E * 3 * E + E * E + 2 * E * H) * num_layers
             + 2 * R * E * V_pad) * num_tiles
    transcend = num_tiles * num_layers * (B * B * nhead * TN + 2 * R)
    bytes_accessed = (int(x.size) * 4 + int(pos.size) * 4
                      + num_tiles * lw_bytes
                      + int(wout.size) * 2 + int(bout.size) * 4
                      + B * S_pad * V_pad * 4)

    kernel = functools.partial(_encoder_kernel, nhead=nhead, eps=1e-5)
    logits = pl.pallas_call(
        kernel,
        out_shape=jax.ShapeDtypeStruct((B, S_pad, V_pad), jnp.float32),
        grid=grid,
        in_specs=in_specs,
        out_specs=out_specs,
        scratch_shapes=[pltpu.VMEM((R, E), jnp.float32),          # activation carry
                        pltpu.VMEM((B, TN, E), jnp.float32)],     # attention assembly
        compiler_params=pltpu.CompilerParams(
            dimension_semantics=("parallel", "arbitrary"),
            vmem_limit_bytes=vmem_limit),
        cost_estimate=pl.CostEstimate(flops=int(flops),
                                      transcendentals=int(transcend),
                                      bytes_accessed=int(bytes_accessed)),
    )(x, pos, *stacked, wout, bout)

    return logits[:, :S, :V]


# --------------------------------------------------------------------------
# Pure-JAX reference (same math, same bf16-matmul / f32-accumulate policy)
# --------------------------------------------------------------------------
def reference_forward(token_ids, params, *, nhead):
    B, S = token_ids.shape
    E = params["embedding"].shape[1]
    hd = E // nhead
    scale = 1.0 / math.sqrt(hd)

    def mm(a, w):
        return jnp.einsum("...k,kj->...j", a.astype(jnp.bfloat16),
                          w.astype(jnp.bfloat16),
                          preferred_element_type=jnp.float32)

    x = params["embedding"][token_ids] + params["pos"][:, :S, :]
    x = jnp.transpose(x, (1, 0, 2))            # (N, L, E): attention over L == B
    N, L, _ = x.shape
    for lp in params["layers"]:
        qkv = mm(x, lp["wqkv"]) + lp["bqkv"]
        q = qkv[..., :E].reshape(N, L, nhead, hd) * scale
        k = qkv[..., E:2 * E].reshape(N, L, nhead, hd)
        v = qkv[..., 2 * E:].reshape(N, L, nhead, hd)
        s = jnp.einsum("nlhd,nmhd->nhlm", q, k,
                       precision=lax.Precision.HIGHEST)
        s = s - jnp.max(s, axis=-1, keepdims=True)
        p = jnp.exp(s)
        p = p / jnp.sum(p, axis=-1, keepdims=True)
        o = jnp.einsum("nhlm,nmhd->nlhd", p, v,
                       precision=lax.Precision.HIGHEST).reshape(N, L, E)
        attn = mm(o, lp["wo"]) + lp["bo"]
        y = _layer_norm(x + attn, lp["ln1w"], lp["ln1b"], 1e-5)
        ff = mm(jnp.maximum(mm(y, lp["w1"]) + lp["b1"], 0.0), lp["w2"]) + lp["b2"]
        x = _layer_norm(y + ff, lp["ln2w"], lp["ln2b"], 1e-5)
    x = jnp.transpose(x, (1, 0, 2))
    return mm(x, params["out_w"]) + params["out_b"]


# --------------------------------------------------------------------------
# Deterministic parameter init (weights pre-transposed to (in, out))
# --------------------------------------------------------------------------
def init_params(key, *, vocab_in, vocab_out, E, H, num_layers, max_seq_len):
    keys = jax.random.split(key, 3 + num_layers)

    def rnd(k, shape, scale):
        return jax.random.normal(k, shape, jnp.float32) * scale

    params = {
        "embedding": rnd(keys[0], (vocab_in, E), 0.1),
        # nn.Parameter(torch.zeros(...)) in __init__; random here to exercise the add
        "pos": rnd(keys[1], (1, max_seq_len, E), 0.02),
        "out_w": rnd(keys[2], (E, vocab_out), 0.05),
        "out_b": jnp.zeros((1, vocab_out), jnp.float32),
        "layers": [],
    }
    for l in range(num_layers):
        lk = jax.random.split(keys[3 + l], 12)
        params["layers"].append({
            "wqkv": rnd(lk[0], (E, 3 * E), 0.05),
            "bqkv": rnd(lk[1], (1, 3 * E), 0.02),
            "wo":   rnd(lk[2], (E, E), 0.05),
            "bo":   rnd(lk[3], (1, E), 0.02),
            "ln1w": jnp.ones((1, E), jnp.float32) + rnd(lk[4], (1, E), 0.01),
            "ln1b": rnd(lk[5], (1, E), 0.01),
            "w1":   rnd(lk[6], (E, H), 0.05),
            "b1":   rnd(lk[7], (1, H), 0.02),
            "w2":   rnd(lk[8], (H, E), 0.05),
            "b2":   rnd(lk[9], (1, E), 0.02),
            "ln2w": jnp.ones((1, E), jnp.float32) + rnd(lk[10], (1, E), 0.01),
            "ln2b": rnd(lk[11], (1, E), 0.01),
        })
    return params


if __name__ == "__main__":
    # Small shapes consistent with the module
    # (original defaults: emb_dim=128, nhead=8, num_layers=7, hidden=256, max_seq_len=150)
    B, S = 2, 16
    E, NHEAD, H, NUM_LAYERS, MAX_SEQ_LEN = 32, 4, 64, 2, 32
    VOCAB_IN, VOCAB_OUT = 40, 24

    key = jax.random.PRNGKey(0)
    pkey, dkey = jax.random.split(key)
    params = init_params(pkey, vocab_in=VOCAB_IN, vocab_out=VOCAB_OUT, E=E, H=H,
                         num_layers=NUM_LAYERS, max_seq_len=MAX_SEQ_LEN)
    token_ids = jax.random.randint(dkey, (B, S), 0, VOCAB_IN, dtype=jnp.int32)

    prepped = prepare_params(params)     # hoisted / cached preprocessing
    # seq_tile=8 -> grid (2 S-tiles, 2 layers) at these demo shapes; the
    # default (balanced) tiling is used for real sequence lengths.
    out = transformer_forward(token_ids, prepped, nhead=NHEAD, seq_tile=8)
    out = jax.block_until_ready(out)

    ref = reference_forward(token_ids, params, nhead=NHEAD)
    assert out.shape == (B, S, VOCAB_OUT), out.shape
    # Both paths share the bf16-matmul / f32-accumulate policy; remaining diff
    # is accumulation order.
    if not bool(jnp.allclose(out, ref, rtol=2e-2, atol=2e-2)):
        raise AssertionError(
            "Pallas output does not match JAX reference; max abs diff = "
            f"{float(jnp.max(jnp.abs(out - ref)))}")
    print("KERNEL_OK")
</pallas_src>

<mosaic_0001>
module attributes {stable_mosaic.version = 11 : i64} {
  func.func @_encoder_kernel(%arg0: i32, %arg1: i32, %arg2: memref<2x8x32xf32, #tpu.memory_space<vmem>>, %arg3: memref<1x8x32xf32, #tpu.memory_space<vmem>>, %arg4: memref<1x32x96xbf16, #tpu.memory_space<vmem>>, %arg5: memref<1x1x96xf32, #tpu.memory_space<vmem>>, %arg6: memref<1x32x32xbf16, #tpu.memory_space<vmem>>, %arg7: memref<1x1x32xf32, #tpu.memory_space<vmem>>, %arg8: memref<1x1x32xf32, #tpu.memory_space<vmem>>, %arg9: memref<1x1x32xf32, #tpu.memory_space<vmem>>, %arg10: memref<1x32x64xbf16, #tpu.memory_space<vmem>>, %arg11: memref<1x1x64xf32, #tpu.memory_space<vmem>>, %arg12: memref<1x64x32xbf16, #tpu.memory_space<vmem>>, %arg13: memref<1x1x32xf32, #tpu.memory_space<vmem>>, %arg14: memref<1x1x32xf32, #tpu.memory_space<vmem>>, %arg15: memref<1x1x32xf32, #tpu.memory_space<vmem>>, %arg16: memref<32x128xbf16, #tpu.memory_space<vmem>>, %arg17: memref<1x128xf32, #tpu.memory_space<vmem>>, %arg18: memref<2x8x128xf32, #tpu.memory_space<vmem>>, %arg19: memref<16x32xf32, #tpu.memory_space<vmem>>, %arg20: memref<2x8x32xf32, #tpu.memory_space<vmem>>) attributes {dimension_semantics = [#tpu.dimension_semantics<parallel>, #tpu.dimension_semantics<arbitrary>], iteration_bounds = array<i64: 2, 2>, scalar_prefetch = 0 : i64, scratch_operands = 2 : i64, tpu.core_type = #tpu.core_type<tc>, window_params = [{transform_indices = @transform_0, window_bounds = array<i64: 2, 8, 32>}, {transform_indices = @transform_1, window_bounds = array<i64: 1, 8, 32>}, {transform_indices = @transform_2, window_bounds = array<i64: 1, 32, 96>}, {transform_indices = @transform_3, window_bounds = array<i64: 1, 1, 96>}, {transform_indices = @transform_4, window_bounds = array<i64: 1, 32, 32>}, {transform_indices = @transform_5, window_bounds = array<i64: 1, 1, 32>}, {transform_indices = @transform_6, window_bounds = array<i64: 1, 1, 32>}, {transform_indices = @transform_7, window_bounds = array<i64: 1, 1, 32>}, {transform_indices = @transform_8, window_bounds = array<i64: 1, 32, 64>}, {transform_indices = @transform_9, window_bounds = array<i64: 1, 1, 64>}, {transform_indices = @transform_10, window_bounds = array<i64: 1, 64, 32>}, {transform_indices = @transform_11, window_bounds = array<i64: 1, 1, 32>}, {transform_indices = @transform_12, window_bounds = array<i64: 1, 1, 32>}, {transform_indices = @transform_13, window_bounds = array<i64: 1, 1, 32>}, {pipeline_mode = #tpu.pipeline_mode<synchronous>, transform_indices = @transform_14, window_bounds = array<i64: 32, 128>}, {pipeline_mode = #tpu.pipeline_mode<synchronous>, transform_indices = @transform_15, window_bounds = array<i64: 1, 128>}, {transform_indices = @transform_16, window_bounds = array<i64: 2, 8, 128>}]} {
    %c0_i32 = arith.constant 0 : i32
    %0 = arith.cmpi eq, %arg1, %c0_i32 : i32
    %1 = arith.extui %0 : i1 to i32
    %c0_i32_0 = arith.constant 0 : i32
    %2 = arith.cmpi ne, %1, %c0_i32_0 : i32
    scf.if %2 {
      %c0_95 = arith.constant 0 : index
      %c0_96 = arith.constant 0 : index
      %c0_97 = arith.constant 0 : index
      %410 = vector.load %arg2[%c0_95, %c0_96, %c0_97] : memref<2x8x32xf32, #tpu.memory_space<vmem>>, vector<2x8x32xf32>
      %c0_98 = arith.constant 0 : index
      %c0_99 = arith.constant 0 : index
      %c0_100 = arith.constant 0 : index
      %411 = vector.load %arg3[%c0_98, %c0_99, %c0_100] : memref<1x8x32xf32, #tpu.memory_space<vmem>>, vector<1x8x32xf32>
      %412 = vector.broadcast %411 : vector<1x8x32xf32> to vector<2x8x32xf32>
      %413 = arith.addf %410, %412 : vector<2x8x32xf32>
      %414 = vector.shape_cast %413 : vector<2x8x32xf32> to vector<16x32xf32>
      %c0_101 = arith.constant 0 : index
      %c0_102 = arith.constant 0 : index
      %415 = vector.load %arg19[%c0_101, %c0_102] : memref<16x32xf32, #tpu.memory_space<vmem>>, vector<16x32xf32>
      tpu.vector_store %arg19[%c0_101, %c0_102], %414 {strides = array<i32>} : memref<16x32xf32, #tpu.memory_space<vmem>>, vector<16x32xf32>,
    } else {
    }
    %c0 = arith.constant 0 : index
    %c0_1 = arith.constant 0 : index
    %3 = vector.load %arg19[%c0, %c0_1] : memref<16x32xf32, #tpu.memory_space<vmem>>, vector<16x32xf32>
    %4 = arith.truncf %3 : vector<16x32xf32> to vector<16x32xbf16>
    %c0_2 = arith.constant 0 : index
    %c0_3 = arith.constant 0 : index
    %c0_4 = arith.constant 0 : index
    %5 = vector.load %arg4[%c0_2, %c0_3, %c0_4] : memref<1x32x96xbf16, #tpu.memory_space<vmem>>, vector<1x32x96xbf16>
    %6 = vector.shape_cast %5 : vector<1x32x96xbf16> to vector<32x96xbf16>
    %cst = arith.constant dense<0.000000e+00> : vector<16x96xf32>
    %7 = tpu.matmul %4, %6, %cst {dimension_numbers = #tpu.dot_dimension_numbers<[1], [0], [0], [1], [0, 0, 1, 1], [], []>} : vector<16x32xbf16>, vector<32x96xbf16>, vector<16x96xf32> -> vector<16x96xf32>
    %c0_5 = arith.constant 0 : index
    %c0_6 = arith.constant 0 : index
    %c0_7 = arith.constant 0 : index
    %8 = vector.load %arg5[%c0_5, %c0_6, %c0_7] : memref<1x1x96xf32, #tpu.memory_space<vmem>>, vector<1x1x96xf32>
    %9 = vector.shape_cast %8 : vector<1x1x96xf32> to vector<1x96xf32>
    %10 = vector.broadcast %9 : vector<1x96xf32> to vector<16x96xf32>
    %11 = arith.addf %7, %10 : vector<16x96xf32>
    %12 = vector.extract_strided_slice %11 {offsets = [0, 0], sizes = [16, 32], strides = [1, 1]} : vector<16x96xf32> to vector<16x32xf32>
    %cst_8 = arith.constant 0.353553385 : f32
    %13 = vector.broadcast %cst_8 : f32 to vector<16x32xf32>
    %14 = arith.mulf %12, %13 : vector<16x32xf32>
    %15 = vector.extract_strided_slice %11 {offsets = [0, 32], sizes = [16, 32], strides = [1, 1]} : vector<16x96xf32> to vector<16x32xf32>
    %16 = vector.extract_strided_slice %11 {offsets = [0, 64], sizes = [16, 32], strides = [1, 1]} : vector<16x96xf32> to vector<16x32xf32>
    %17 = vector.shape_cast %14 : vector<16x32xf32> to vector<2x8x32xf32>
    %18 = vector.shape_cast %15 : vector<16x32xf32> to vector<2x8x32xf32>
    %19 = vector.shape_cast %16 : vector<16x32xf32> to vector<2x8x32xf32>
    %20 = vector.extract_strided_slice %17 {offsets = [0, 0, 0], sizes = [1, 8, 32], strides = [1, 1, 1]} : vector<2x8x32xf32> to vector<1x8x32xf32>
    %21 = vector.shape_cast %20 : vector<1x8x32xf32> to vector<8x32xf32>
    %22 = vector.extract_strided_slice %21 {offsets = [0, 0], sizes = [8, 8], strides = [1, 1]} : vector<8x32xf32> to vector<8x8xf32>
    %23 = vector.extract_strided_slice %18 {offsets = [0, 0, 0], sizes = [1, 8, 32], strides = [1, 1, 1]} : vector<2x8x32xf32> to vector<1x8x32xf32>
    %24 = vector.shape_cast %23 : vector<1x8x32xf32> to vector<8x32xf32>
    %25 = vector.extract_strided_slice %24 {offsets = [0, 0], sizes = [8, 8], strides = [1, 1]} : vector<8x32xf32> to vector<8x8xf32>
    %26 = arith.mulf %22, %25 : vector<8x8xf32>
    %cst_9 = arith.constant dense<0.000000e+00> : vector<8xf32>
    %27 = vector.multi_reduction <add>, %26, %cst_9 [1] : vector<8x8xf32> to vector<8xf32>
    %28 = vector.shape_cast %27 : vector<8xf32> to vector<8x1xf32>
    %29 = vector.extract_strided_slice %18 {offsets = [1, 0, 0], sizes = [1, 8, 32], strides = [1, 1, 1]} : vector<2x8x32xf32> to vector<1x8x32xf32>
    %30 = vector.shape_cast %29 : vector<1x8x32xf32> to vector<8x32xf32>
    %31 = vector.extract_strided_slice %30 {offsets = [0, 0], sizes = [8, 8], strides = [1, 1]} : vector<8x32xf32> to vector<8x8xf32>
    %32 = arith.mulf %22, %31 : vector<8x8xf32>
    %cst_10 = arith.constant dense<0.000000e+00> : vector<8xf32>
    %33 = vector.multi_reduction <add>, %32, %cst_10 [1] : vector<8x8xf32> to vector<8xf32>
    %34 = vector.shape_cast %33 : vector<8xf32> to vector<8x1xf32>
    %35 = arith.maximumf %28, %34 : vector<8x1xf32>
    %36 = arith.subf %28, %35 : vector<8x1xf32>
    %37 = math.exp %36 : vector<8x1xf32>
    %38 = arith.subf %34, %35 : vector<8x1xf32>
    %39 = math.exp %38 : vector<8x1xf32>
    %40 = arith.addf %37, %39 : vector<8x1xf32>
    %41 = tpu.reciprocal %40 : vector<8x1xf32> -> vector<8x1xf32>
    %42 = arith.mulf %37, %41 : vector<8x1xf32>
    %43 = vector.extract_strided_slice %19 {offsets = [0, 0, 0], sizes = [1, 8, 32], strides = [1, 1, 1]} : vector<2x8x32xf32> to vector<1x8x32xf32>
    %44 = vector.shape_cast %43 : vector<1x8x32xf32> to vector<8x32xf32>
    %45 = vector.extract_strided_slice %44 {offsets = [0, 0], sizes = [8, 8], strides = [1, 1]} : vector<8x32xf32> to vector<8x8xf32>
    %46 = vector.broadcast %42 : vector<8x1xf32> to vector<8x8xf32>
    %47 = arith.mulf %46, %45 : vector<8x8xf32>
    %48 = arith.mulf %39, %41 : vector<8x1xf32>
    %49 = vector.extract_strided_slice %19 {offsets = [1, 0, 0], sizes = [1, 8, 32], strides = [1, 1, 1]} : vector<2x8x32xf32> to vector<1x8x32xf32>
    %50 = vector.shape_cast %49 : vector<1x8x32xf32> to vector<8x32xf32>
    %51 = vector.extract_strided_slice %50 {offsets = [0, 0], sizes = [8, 8], strides = [1, 1]} : vector<8x32xf32> to vector<8x8xf32>
    %52 = vector.broadcast %48 : vector<8x1xf32> to vector<8x8xf32>
    %53 = arith.mulf %52, %51 : vector<8x8xf32>
    %54 = arith.addf %47, %53 : vector<8x8xf32>
    %c0_11 = arith.constant 0 : index
    %c0_12 = arith.constant 0 : index
    %c0_13 = arith.constant 0 : index
    %55 = vector.load %arg20[%c0_11, %c0_12, %c0_13] : memref<2x8x32xf32, #tpu.memory_space<vmem>>, vector<1x8x8xf32>
    %56 = vector.shape_cast %55 : vector<1x8x8xf32> to vector<8x8xf32>
    %57 = vector.shape_cast %54 : vector<8x8xf32> to vector<1x8x8xf32>
    tpu.vector_store %arg20[%c0_11, %c0_12, %c0_13], %57 {strides = array<i32>} : memref<2x8x32xf32, #tpu.memory_space<vmem>>, vector<1x8x8xf32>,
    %58 = vector.extract_strided_slice %17 {offsets = [0, 0, 0], sizes = [1, 8, 32], strides = [1, 1, 1]} : vector<2x8x32xf32> to vector<1x8x32xf32>
    %59 = vector.shape_cast %58 : vector<1x8x32xf32> to vector<8x32xf32>
    %60 = vector.extract_strided_slice %59 {offsets = [0, 8], sizes = [8, 8], strides = [1, 1]} : vector<8x32xf32> to vector<8x8xf32>
    %61 = vector.extract_strided_slice %18 {offsets = [0, 0, 0], sizes = [1, 8, 32], strides = [1, 1, 1]} : vector<2x8x32xf32> to vector<1x8x32xf32>
    %62 = vector.shape_cast %61 : vector<1x8x32xf32> to vector<8x32xf32>
    %63 = vector.extract_strided_slice %62 {offsets = [0, 8], sizes = [8, 8], strides = [1, 1]} : vector<8x32xf32> to vector<8x8xf32>
    %64 = arith.mulf %60, %63 : vector<8x8xf32>
    %cst_14 = arith.constant dense<0.000000e+00> : vector<8xf32>
    %65 = vector.multi_reduction <add>, %64, %cst_14 [1] : vector<8x8xf32> to vector<8xf32>
    %66 = vector.shape_cast %65 : vector<8xf32> to vector<8x1xf32>
    %67 = vector.extract_strided_slice %18 {offsets = [1, 0, 0], sizes = [1, 8, 32], strides = [1, 1, 1]} : vector<2x8x32xf32> to vector<1x8x32xf32>
    %68 = vector.shape_cast %67 : vector<1x8x32xf32> to vector<8x32xf32>
    %69 = vector.extract_strided_slice %68 {offsets = [0, 8], sizes = [8, 8], strides = [1, 1]} : vector<8x32xf32> to vector<8x8xf32>
    %70 = arith.mulf %60, %69 : vector<8x8xf32>
    %cst_15 = arith.constant dense<0.000000e+00> : vector<8xf32>
    %71 = vector.multi_reduction <add>, %70, %cst_15 [1] : vector<8x8xf32> to vector<8xf32>
    %72 = vector.shape_cast %71 : vector<8xf32> to vector<8x1xf32>
    %73 = arith.maximumf %66, %72 : vector<8x1xf32>
    %74 = arith.subf %66, %73 : vector<8x1xf32>
    %75 = math.exp %74 : vector<8x1xf32>
    %76 = arith.subf %72, %73 : vector<8x1xf32>
    %77 = math.exp %76 : vector<8x1xf32>
    %78 = arith.addf %75, %77 : vector<8x1xf32>
    %79 = tpu.reciprocal %78 : vector<8x1xf32> -> vector<8x1xf32>
    %80 = arith.mulf %75, %79 : vector<8x1xf32>
    %81 = vector.extract_strided_slice %19 {offsets = [0, 0, 0], sizes = [1, 8, 32], strides = [1, 1, 1]} : vector<2x8x32xf32> to vector<1x8x32xf32>
    %82 = vector.shape_cast %81 : vector<1x8x32xf32> to vector<8x32xf32>
    %83 = vector.extract_strided_slice %82 {offsets = [0, 8], sizes = [8, 8], strides = [1, 1]} : vector<8x32xf32> to vector<8x8xf32>
    %84 = vector.broadcast %80 : vector<8x1xf32> to vector<8x8xf32>
    %85 = arith.mulf %84, %83 : vector<8x8xf32>
    %86 = arith.mulf %77, %79 : vector<8x1xf32>
    %87 = vector.extract_strided_slice %19 {offsets = [1, 0, 0], sizes = [1, 8, 32], strides = [1, 1, 1]} : vector<2x8x32xf32> to vector<1x8x32xf32>
    %88 = vector.shape_cast %87 : vector<1x8x32xf32> to vector<8x32xf32>
    %89 = vector.extract_strided_slice %88 {offsets = [0, 8], sizes = [8, 8], strides = [1, 1]} : vector<8x32xf32> to vector<8x8xf32>
    %90 = vector.broadcast %86 : vector<8x1xf32> to vector<8x8xf32>
    %91 = arith.mulf %90, %89 : vector<8x8xf32>
    %92 = arith.addf %85, %91 : vector<8x8xf32>
    %c0_16 = arith.constant 0 : index
    %c0_17 = arith.constant 0 : index
    %c8 = arith.constant 8 : index
    %93 = vector.load %arg20[%c0_16, %c0_17, %c8] : memref<2x8x32xf32, #tpu.memory_space<vmem>>, vector<1x8x8xf32>
    %94 = vector.shape_cast %93 : vector<1x8x8xf32> to vector<8x8xf32>
    %95 = vector.shape_cast %92 : vector<8x8xf32> to vector<1x8x8xf32>
    tpu.vector_store %arg20[%c0_16, %c0_17, %c8], %95 {strides = array<i32>} : memref<2x8x32xf32, #tpu.memory_space<vmem>>, vector<1x8x8xf32>,
    %96 = vector.extract_strided_slice %17 {offsets = [0, 0, 0], sizes = [1, 8, 32], strides = [1, 1, 1]} : vector<2x8x32xf32> to vector<1x8x32xf32>
    %97 = vector.shape_cast %96 : vector<1x8x32xf32> to vector<8x32xf32>
    %98 = vector.extract_strided_slice %97 {offsets = [0, 16], sizes = [8, 8], strides = [1, 1]} : vector<8x32xf32> to vector<8x8xf32>
    %99 = vector.extract_strided_slice %18 {offsets = [0, 0, 0], sizes = [1, 8, 32], strides = [1, 1, 1]} : vector<2x8x32xf32> to vector<1x8x32xf32>
    %100 = vector.shape_cast %99 : vector<1x8x32xf32> to vector<8x32xf32>
    %101 = vector.extract_strided_slice %100 {offsets = [0, 16], sizes = [8, 8], strides = [1, 1]} : vector<8x32xf32> to vector<8x8xf32>
    %102 = arith.mulf %98, %101 : vector<8x8xf32>
    %cst_18 = arith.constant dense<0.000000e+00> : vector<8xf32>
    %103 = vector.multi_reduction <add>, %102, %cst_18 [1] : vector<8x8xf32> to vector<8xf32>
    %104 = vector.shape_cast %103 : vector<8xf32> to vector<8x1xf32>
    %105 = vector.extract_strided_slice %18 {offsets = [1, 0, 0], sizes = [1, 8, 32], strides = [1, 1, 1]} : vector<2x8x32xf32> to vector<1x8x32xf32>
    %106 = vector.shape_cast %105 : vector<1x8x32xf32> to vector<8x32xf32>
    %107 = vector.extract_strided_slice %106 {offsets = [0, 16], sizes = [8, 8], strides = [1, 1]} : vector<8x32xf32> to vector<8x8xf32>
    %108 = arith.mulf %98, %107 : vector<8x8xf32>
    %cst_19 = arith.constant dense<0.000000e+00> : vector<8xf32>
    %109 = vector.multi_reduction <add>, %108, %cst_19 [1] : vector<8x8xf32> to vector<8xf32>
    %110 = vector.shape_cast %109 : vector<8xf32> to vector<8x1xf32>
    %111 = arith.maximumf %104, %110 : vector<8x1xf32>
    %112 = arith.subf %104, %111 : vector<8x1xf32>
    %113 = math.exp %112 : vector<8x1xf32>
    %114 = arith.subf %110, %111 : vector<8x1xf32>
    %115 = math.exp %114 : vector<8x1xf32>
    %116 = arith.addf %113, %115 : vector<8x1xf32>
    %117 = tpu.reciprocal %116 : vector<8x1xf32> -> vector<8x1xf32>
    %118 = arith.mulf %113, %117 : vector<8x1xf32>
    %119 = vector.extract_strided_slice %19 {offsets = [0, 0, 0], sizes = [1, 8, 32], strides = [1, 1, 1]} : vector<2x8x32xf32> to vector<1x8x32xf32>
    %120 = vector.shape_cast %119 : vector<1x8x32xf32> to vector<8x32xf32>
    %121 = vector.extract_strided_slice %120 {offsets = [0, 16], sizes = [8, 8], strides = [1, 1]} : vector<8x32xf32> to vector<8x8xf32>
    %122 = vector.broadcast %118 : vector<8x1xf32> to vector<8x8xf32>
    %123 = arith.mulf %122, %121 : vector<8x8xf32>
    %124 = arith.mulf %115, %117 : vector<8x1xf32>
    %125 = vector.extract_strided_slice %19 {offsets = [1, 0, 0], sizes = [1, 8, 32], strides = [1, 1, 1]} : vector<2x8x32xf32> to vector<1x8x32xf32>
    %126 = vector.shape_cast %125 : vector<1x8x32xf32> to vector<8x32xf32>
    %127 = vector.extract_strided_slice %126 {offsets = [0, 16], sizes = [8, 8], strides = [1, 1]} : vector<8x32xf32> to vector<8x8xf32>
    %128 = vector.broadcast %124 : vector<8x1xf32> to vector<8x8xf32>
    %129 = arith.mulf %128, %127 : vector<8x8xf32>
    %130 = arith.addf %123, %129 : vector<8x8xf32>
    %c0_20 = arith.constant 0 : index
    %c0_21 = arith.constant 0 : index
    %c16 = arith.constant 16 : index
    %131 = vector.load %arg20[%c0_20, %c0_21, %c16] : memref<2x8x32xf32, #tpu.memory_space<vmem>>, vector<1x8x8xf32>
    %132 = vector.shape_cast %131 : vector<1x8x8xf32> to vector<8x8xf32>
    %133 = vector.shape_cast %130 : vector<8x8xf32> to vector<1x8x8xf32>
    tpu.vector_store %arg20[%c0_20, %c0_21, %c16], %133 {strides = array<i32>} : memref<2x8x32xf32, #tpu.memory_space<vmem>>, vector<1x8x8xf32>,
    %134 = vector.extract_strided_slice %17 {offsets = [0, 0, 0], sizes = [1, 8, 32], strides = [1, 1, 1]} : vector<2x8x32xf32> to vector<1x8x32xf32>
    %135 = vector.shape_cast %134 : vector<1x8x32xf32> to vector<8x32xf32>
    %136 = vector.extract_strided_slice %135 {offsets = [0, 24], sizes = [8, 8], strides = [1, 1]} : vector<8x32xf32> to vector<8x8xf32>
    %137 = vector.extract_strided_slice %18 {offsets = [0, 0, 0], sizes = [1, 8, 32], strides = [1, 1, 1]} : vector<2x8x32xf32> to vector<1x8x32xf32>
    %138 = vector.shape_cast %137 : vector<1x8x32xf32> to vector<8x32xf32>
    %139 = vector.extract_strided_slice %138 {offsets = [0, 24], sizes = [8, 8], strides = [1, 1]} : vector<8x32xf32> to vector<8x8xf32>
    %140 = arith.mulf %136, %139 : vector<8x8xf32>
    %cst_22 = arith.constant dense<0.000000e+00> : vector<8xf32>
    %141 = vector.multi_reduction <add>, %140, %cst_22 [1] : vector<8x8xf32> to vector<8xf32>
    %142 = vector.shape_cast %141 : vector<8xf32> to vector<8x1xf32>
    %143 = vector.extract_strided_slice %18 {offsets = [1, 0, 0], sizes = [1, 8, 32], strides = [1, 1, 1]} : vector<2x8x32xf32> to vector<1x8x32xf32>
    %144 = vector.shape_cast %143 : vector<1x8x32xf32> to vector<8x32xf32>
    %145 = vector.extract_strided_slice %144 {offsets = [0, 24], sizes = [8, 8], strides = [1, 1]} : vector<8x32xf32> to vector<8x8xf32>
    %146 = arith.mulf %136, %145 : vector<8x8xf32>
    %cst_23 = arith.constant dense<0.000000e+00> : vector<8xf32>
    %147 = vector.multi_reduction <add>, %146, %cst_23 [1] : vector<8x8xf32> to vector<8xf32>
    %148 = vector.shape_cast %147 : vector<8xf32> to vector<8x1xf32>
    %149 = arith.maximumf %142, %148 : vector<8x1xf32>
    %150 = arith.subf %142, %149 : vector<8x1xf32>
    %151 = math.exp %150 : vector<8x1xf32>
    %152 = arith.subf %148, %149 : vector<8x1xf32>
    %153 = math.exp %152 : vector<8x1xf32>
    %154 = arith.addf %151, %153 : vector<8x1xf32>
    %155 = tpu.reciprocal %154 : vector<8x1xf32> -> vector<8x1xf32>
    %156 = arith.mulf %151, %155 : vector<8x1xf32>
    %157 = vector.extract_strided_slice %19 {offsets = [0, 0, 0], sizes = [1, 8, 32], strides = [1, 1, 1]} : vector<2x8x32xf32> to vector<1x8x32xf32>
    %158 = vector.shape_cast %157 : vector<1x8x32xf32> to vector<8x32xf32>
    %159 = vector.extract_strided_slice %158 {offsets = [0, 24], sizes = [8, 8], strides = [1, 1]} : vector<8x32xf32> to vector<8x8xf32>
    %160 = vector.broadcast %156 : vector<8x1xf32> to vector<8x8xf32>
    %161 = arith.mulf %160, %159 : vector<8x8xf32>
    %162 = arith.mulf %153, %155 : vector<8x1xf32>
    %163 = vector.extract_strided_slice %19 {offsets = [1, 0, 0], sizes = [1, 8, 32], strides = [1, 1, 1]} : vector<2x8x32xf32> to vector<1x8x32xf32>
    %164 = vector.shape_cast %163 : vector<1x8x32xf32> to vector<8x32xf32>
    %165 = vector.extract_strided_slice %164 {offsets = [0, 24], sizes = [8, 8], strides = [1, 1]} : vector<8x32xf32> to vector<8x8xf32>
    %166 = vector.broadcast %162 : vector<8x1xf32> to vector<8x8xf32>
    %167 = arith.mulf %166, %165 : vector<8x8xf32>
    %168 = arith.addf %161, %167 : vector<8x8xf32>
    %c0_24 = arith.constant 0 : index
    %c0_25 = arith.constant 0 : index
    %c24 = arith.constant 24 : index
    %169 = vector.load %arg20[%c0_24, %c0_25, %c24] : memref<2x8x32xf32, #tpu.memory_space<vmem>>, vector<1x8x8xf32>
    %170 = vector.shape_cast %169 : vector<1x8x8xf32> to vector<8x8xf32>
    %171 = vector.shape_cast %168 : vector<8x8xf32> to vector<1x8x8xf32>
    tpu.vector_store %arg20[%c0_24, %c0_25, %c24], %171 {strides = array<i32>} : memref<2x8x32xf32, #tpu.memory_space<vmem>>, vector<1x8x8xf32>,
    %172 = vector.extract_strided_slice %17 {offsets = [1, 0, 0], sizes = [1, 8, 32], strides = [1, 1, 1]} : vector<2x8x32xf32> to vector<1x8x32xf32>
    %173 = vector.shape_cast %172 : vector<1x8x32xf32> to vector<8x32xf32>
    %174 = vector.extract_strided_slice %173 {offsets = [0, 0], sizes = [8, 8], strides = [1, 1]} : vector<8x32xf32> to vector<8x8xf32>
    %175 = vector.extract_strided_slice %18 {offsets = [0, 0, 0], sizes = [1, 8, 32], strides = [1, 1, 1]} : vector<2x8x32xf32> to vector<1x8x32xf32>
    %176 = vector.shape_cast %175 : vector<1x8x32xf32> to vector<8x32xf32>
    %177 = vector.extract_strided_slice %176 {offsets = [0, 0], sizes = [8, 8], strides = [1, 1]} : vector<8x32xf32> to vector<8x8xf32>
    %178 = arith.mulf %174, %177 : vector<8x8xf32>
    %cst_26 = arith.constant dense<0.000000e+00> : vector<8xf32>
    %179 = vector.multi_reduction <add>, %178, %cst_26 [1] : vector<8x8xf32> to vector<8xf32>
    %180 = vector.shape_cast %179 : vector<8xf32> to vector<8x1xf32>
    %181 = vector.extract_strided_slice %18 {offsets = [1, 0, 0], sizes = [1, 8, 32], strides = [1, 1, 1]} : vector<2x8x32xf32> to vector<1x8x32xf32>
    %182 = vector.shape_cast %181 : vector<1x8x32xf32> to vector<8x32xf32>
    %183 = vector.extract_strided_slice %182 {offsets = [0, 0], sizes = [8, 8], strides = [1, 1]} : vector<8x32xf32> to vector<8x8xf32>
    %184 = arith.mulf %174, %183 : vector<8x8xf32>
    %cst_27 = arith.constant dense<0.000000e+00> : vector<8xf32>
    %185 = vector.multi_reduction <add>, %184, %cst_27 [1] : vector<8x8xf32> to vector<8xf32>
    %186 = vector.shape_cast %185 : vector<8xf32> to vector<8x1xf32>
    %187 = arith.maximumf %180, %186 : vector<8x1xf32>
    %188 = arith.subf %180, %187 : vector<8x1xf32>
    %189 = math.exp %188 : vector<8x1xf32>
    %190 = arith.subf %186, %187 : vector<8x1xf32>
    %191 = math.exp %190 : vector<8x1xf32>
    %192 = arith.addf %189, %191 : vector<8x1xf32>
    %193 = tpu.reciprocal %192 : vector<8x1xf32> -> vector<8x1xf32>
    %194 = arith.mulf %189, %193 : vector<8x1xf32>
    %195 = vector.extract_strided_slice %19 {offsets = [0, 0, 0], sizes = [1, 8, 32], strides = [1, 1, 1]} : vector<2x8x32xf32> to vector<1x8x32xf32>
    %196 = vector.shape_cast %195 : vector<1x8x32xf32> to vector<8x32xf32>
    %197 = vector.extract_strided_slice %196 {offsets = [0, 0], sizes = [8, 8], strides = [1, 1]} : vector<8x32xf32> to vector<8x8xf32>
    %198 = vector.broadcast %194 : vector<8x1xf32> to vector<8x8xf32>
    %199 = arith.mulf %198, %197 : vector<8x8xf32>
    %200 = arith.mulf %191, %193 : vector<8x1xf32>
    %201 = vector.extract_strided_slice %19 {offsets = [1, 0, 0], sizes = [1, 8, 32], strides = [1, 1, 1]} : vector<2x8x32xf32> to vector<1x8x32xf32>
    %202 = vector.shape_cast %201 : vector<1x8x32xf32> to vector<8x32xf32>
    %203 = vector.extract_strided_slice %202 {offsets = [0, 0], sizes = [8, 8], strides = [1, 1]} : vector<8x32xf32> to vector<8x8xf32>
    %204 = vector.broadcast %200 : vector<8x1xf32> to vector<8x8xf32>
    %205 = arith.mulf %204, %203 : vector<8x8xf32>
    %206 = arith.addf %199, %205 : vector<8x8xf32>
    %c1 = arith.constant 1 : index
    %c0_28 = arith.constant 0 : index
    %c0_29 = arith.constant 0 : index
    %207 = vector.load %arg20[%c1, %c0_28, %c0_29] : memref<2x8x32xf32, #tpu.memory_space<vmem>>, vector<1x8x8xf32>
    %208 = vector.shape_cast %207 : vector<1x8x8xf32> to vector<8x8xf32>
    %209 = vector.shape_cast %206 : vector<8x8xf32> to vector<1x8x8xf32>
    tpu.vector_store %arg20[%c1, %c0_28, %c0_29], %209 {strides = array<i32>} : memref<2x8x32xf32, #tpu.memory_space<vmem>>, vector<1x8x8xf32>,
    %210 = vector.extract_strided_slice %17 {offsets = [1, 0, 0], sizes = [1, 8, 32], strides = [1, 1, 1]} : vector<2x8x32xf32> to vector<1x8x32xf32>
    %211 = vector.shape_cast %210 : vector<1x8x32xf32> to vector<8x32xf32>
    %212 = vector.extract_strided_slice %211 {offsets = [0, 8], sizes = [8, 8], strides = [1, 1]} : vector<8x32xf32> to vector<8x8xf32>
    %213 = vector.extract_strided_slice %18 {offsets = [0, 0, 0], sizes = [1, 8, 32], strides = [1, 1, 1]} : vector<2x8x32xf32> to vector<1x8x32xf32>
    %214 = vector.shape_cast %213 : vector<1x8x32xf32> to vector<8x32xf32>
    %215 = vector.extract_strided_slice %214 {offsets = [0, 8], sizes = [8, 8], strides = [1, 1]} : vector<8x32xf32> to vector<8x8xf32>
    %216 = arith.mulf %212, %215 : vector<8x8xf32>
    %cst_30 = arith.constant dense<0.000000e+00> : vector<8xf32>
    %217 = vector.multi_reduction <add>, %216, %cst_30 [1] : vector<8x8xf32> to vector<8xf32>
    %218 = vector.shape_cast %217 : vector<8xf32> to vector<8x1xf32>
    %219 = vector.extract_strided_slice %18 {offsets = [1, 0, 0], sizes = [1, 8, 32], strides = [1, 1, 1]} : vector<2x8x32xf32> to vector<1x8x32xf32>
    %220 = vector.shape_cast %219 : vector<1x8x32xf32> to vector<8x32xf32>
    %221 = vector.extract_strided_slice %220 {offsets = [0, 8], sizes = [8, 8], strides = [1, 1]} : vector<8x32xf32> to vector<8x8xf32>
    %222 = arith.mulf %212, %221 : vector<8x8xf32>
    %cst_31 = arith.constant dense<0.000000e+00> : vector<8xf32>
    %223 = vector.multi_reduction <add>, %222, %cst_31 [1] : vector<8x8xf32> to vector<8xf32>
    %224 = vector.shape_cast %223 : vector<8xf32> to vector<8x1xf32>
    %225 = arith.maximumf %218, %224 : vector<8x1xf32>
    %226 = arith.subf %218, %225 : vector<8x1xf32>
    %227 = math.exp %226 : vector<8x1xf32>
    %228 = arith.subf %224, %225 : vector<8x1xf32>
    %229 = math.exp %228 : vector<8x1xf32>
    %230 = arith.addf %227, %229 : vector<8x1xf32>
    %231 = tpu.reciprocal %230 : vector<8x1xf32> -> vector<8x1xf32>
    %232 = arith.mulf %227, %231 : vector<8x1xf32>
    %233 = vector.extract_strided_slice %19 {offsets = [0, 0, 0], sizes = [1, 8, 32], strides = [1, 1, 1]} : vector<2x8x32xf32> to vector<1x8x32xf32>
    %234 = vector.shape_cast %233 : vector<1x8x32xf32> to vector<8x32xf32>
    %235 = vector.extract_strided_slice %234 {offsets = [0, 8], sizes = [8, 8], strides = [1, 1]} : vector<8x32xf32> to vector<8x8xf32>
    %236 = vector.broadcast %232 : vector<8x1xf32> to vector<8x8xf32>
    %237 = arith.mulf %236, %235 : vector<8x8xf32>
    %238 = arith.mulf %229, %231 : vector<8x1xf32>
    %239 = vector.extract_strided_slice %19 {offsets = [1, 0, 0], sizes = [1, 8, 32], strides = [1, 1, 1]} : vector<2x8x32xf32> to vector<1x8x32xf32>
    %240 = vector.shape_cast %239 : vector<1x8x32xf32> to vector<8x32xf32>
    %241 = vector.extract_strided_slice %240 {offsets = [0, 8], sizes = [8, 8], strides = [1, 1]} : vector<8x32xf32> to vector<8x8xf32>
    %242 = vector.broadcast %238 : vector<8x1xf32> to vector<8x8xf32>
    %243 = arith.mulf %242, %241 : vector<8x8xf32>
    %244 = arith.addf %237, %243 : vector<8x8xf32>
    %c1_32 = arith.constant 1 : index
    %c0_33 = arith.constant 0 : index
    %c8_34 = arith.constant 8 : index
    %245 = vector.load %arg20[%c1_32, %c0_33, %c8_34] : memref<2x8x32xf32, #tpu.memory_space<vmem>>, vector<1x8x8xf32>
    %246 = vector.shape_cast %245 : vector<1x8x8xf32> to vector<8x8xf32>
    %247 = vector.shape_cast %244 : vector<8x8xf32> to vector<1x8x8xf32>
    tpu.vector_store %arg20[%c1_32, %c0_33, %c8_34], %247 {strides = array<i32>} : memref<2x8x32xf32, #tpu.memory_space<vmem>>, vector<1x8x8xf32>,
    %248 = vector.extract_strided_slice %17 {offsets = [1, 0, 0], sizes = [1, 8, 32], strides = [1, 1, 1]} : vector<2x8x32xf32> to vector<1x8x32xf32>
    %249 = vector.shape_cast %248 : vector<1x8x32xf32> to vector<8x32xf32>
    %250 = vector.extract_strided_slice %249 {offsets = [0, 16], sizes = [8, 8], strides = [1, 1]} : vector<8x32xf32> to vector<8x8xf32>
    %251 = vector.extract_strided_slice %18 {offsets = [0, 0, 0], sizes = [1, 8, 32], strides = [1, 1, 1]} : vector<2x8x32xf32> to vector<1x8x32xf32>
    %252 = vector.shape_cast %251 : vector<1x8x32xf32> to vector<8x32xf32>
    %253 = vector.extract_strided_slice %252 {offsets = [0, 16], sizes = [8, 8], strides = [1, 1]} : vector<8x32xf32> to vector<8x8xf32>
    %254 = arith.mulf %250, %253 : vector<8x8xf32>
    %cst_35 = arith.constant dense<0.000000e+00> : vector<8xf32>
    %255 = vector.multi_reduction <add>, %254, %cst_35 [1] : vector<8x8xf32> to vector<8xf32>
    %256 = vector.shape_cast %255 : vector<8xf32> to vector<8x1xf32>
    %257 = vector.extract_strided_slice %18 {offsets = [1, 0, 0], sizes = [1, 8, 32], strides = [1, 1, 1]} : vector<2x8x32xf32> to vector<1x8x32xf32>
    %258 = vector.shape_cast %257 : vector<1x8x32xf32> to vector<8x32xf32>
    %259 = vector.extract_strided_slice %258 {offsets = [0, 16], sizes = [8, 8], strides = [1, 1]} : vector<8x32xf32> to vector<8x8xf32>
    %260 = arith.mulf %250, %259 : vector<8x8xf32>
    %cst_36 = arith.constant dense<0.000000e+00> : vector<8xf32>
    %261 = vector.multi_reduction <add>, %260, %cst_36 [1] : vector<8x8xf32> to vector<8xf32>
    %262 = vector.shape_cast %261 : vector<8xf32> to vector<8x1xf32>
    %263 = arith.maximumf %256, %262 : vector<8x1xf32>
    %264 = arith.subf %256, %263 : vector<8x1xf32>
    %265 = math.exp %264 : vector<8x1xf32>
    %266 = arith.subf %262, %263 : vector<8x1xf32>
    %267 = math.exp %266 : vector<8x1xf32>
    %268 = arith.addf %265, %267 : vector<8x1xf32>
    %269 = tpu.reciprocal %268 : vector<8x1xf32> -> vector<8x1xf32>
    %270 = arith.mulf %265, %269 : vector<8x1xf32>
    %271 = vector.extract_strided_slice %19 {offsets = [0, 0, 0], sizes = [1, 8, 32], strides = [1, 1, 1]} : vector<2x8x32xf32> to vector<1x8x32xf32>
    %272 = vector.shape_cast %271 : vector<1x8x32xf32> to vector<8x32xf32>
    %273 = vector.extract_strided_slice %272 {offsets = [0, 16], sizes = [8, 8], strides = [1, 1]} : vector<8x32xf32> to vector<8x8xf32>
    %274 = vector.broadcast %270 : vector<8x1xf32> to vector<8x8xf32>
    %275 = arith.mulf %274, %273 : vector<8x8xf32>
    %276 = arith.mulf %267, %269 : vector<8x1xf32>
    %277 = vector.extract_strided_slice %19 {offsets = [1, 0, 0], sizes = [1, 8, 32], strides = [1, 1, 1]} : vector<2x8x32xf32> to vector<1x8x32xf32>
    %278 = vector.shape_cast %277 : vector<1x8x32xf32> to vector<8x32xf32>
    %279 = vector.extract_strided_slice %278 {offsets = [0, 16], sizes = [8, 8], strides = [1, 1]} : vector<8x32xf32> to vector<8x8xf32>
    %280 = vector.broadcast %276 : vector<8x1xf32> to vector<8x8xf32>
    %281 = arith.mulf %280, %279 : vector<8x8xf32>
    %282 = arith.addf %275, %281 : vector<8x8xf32>
    %c1_37 = arith.constant 1 : index
    %c0_38 = arith.constant 0 : index
    %c16_39 = arith.constant 16 : index
    %283 = vector.load %arg20[%c1_37, %c0_38, %c16_39] : memref<2x8x32xf32, #tpu.memory_space<vmem>>, vector<1x8x8xf32>
    %284 = vector.shape_cast %283 : vector<1x8x8xf32> to vector<8x8xf32>
    %285 = vector.shape_cast %282 : vector<8x8xf32> to vector<1x8x8xf32>
    tpu.vector_store %arg20[%c1_37, %c0_38, %c16_39], %285 {strides = array<i32>} : memref<2x8x32xf32, #tpu.memory_space<vmem>>, vector<1x8x8xf32>,
    %286 = vector.extract_strided_slice %17 {offsets = [1, 0, 0], sizes = [1, 8, 32], strides = [1, 1, 1]} : vector<2x8x32xf32> to vector<1x8x32xf32>
    %287 = vector.shape_cast %286 : vector<1x8x32xf32> to vector<8x32xf32>
    %288 = vector.extract_strided_slice %287 {offsets = [0, 24], sizes = [8, 8], strides = [1, 1]} : vector<8x32xf32> to vector<8x8xf32>
    %289 = vector.extract_strided_slice %18 {offsets = [0, 0, 0], sizes = [1, 8, 32], strides = [1, 1, 1]} : vector<2x8x32xf32> to vector<1x8x32xf32>
    %290 = vector.shape_cast %289 : vector<1x8x32xf32> to vector<8x32xf32>
    %291 = vector.extract_strided_slice %290 {offsets = [0, 24], sizes = [8, 8], strides = [1, 1]} : vector<8x32xf32> to vector<8x8xf32>
    %292 = arith.mulf %288, %291 : vector<8x8xf32>
    %cst_40 = arith.constant dense<0.000000e+00> : vector<8xf32>
    %293 = vector.multi_reduction <add>, %292, %cst_40 [1] : vector<8x8xf32> to vector<8xf32>
    %294 = vector.shape_cast %293 : vector<8xf32> to vector<8x1xf32>
    %295 = vector.extract_strided_slice %18 {offsets = [1, 0, 0], sizes = [1, 8, 32], strides = [1, 1, 1]} : vector<2x8x32xf32> to vector<1x8x32xf32>
    %296 = vector.shape_cast %295 : vector<1x8x32xf32> to vector<8x32xf32>
    %297 = vector.extract_strided_slice %296 {offsets = [0, 24], sizes = [8, 8], strides = [1, 1]} : vector<8x32xf32> to vector<8x8xf32>
    %298 = arith.mulf %288, %297 : vector<8x8xf32>
    %cst_41 = arith.constant dense<0.000000e+00> : vector<8xf32>
    %299 = vector.multi_reduction <add>, %298, %cst_41 [1] : vector<8x8xf32> to vector<8xf32>
    %300 = vector.shape_cast %299 : vector<8xf32> to vector<8x1xf32>
    %301 = arith.maximumf %294, %300 : vector<8x1xf32>
    %302 = arith.subf %294, %301 : vector<8x1xf32>
    %303 = math.exp %302 : vector<8x1xf32>
    %304 = arith.subf %300, %301 : vector<8x1xf32>
    %305 = math.exp %304 : vector<8x1xf32>
    %306 = arith.addf %303, %305 : vector<8x1xf32>
    %307 = tpu.reciprocal %306 : vector<8x1xf32> -> vector<8x1xf32>
    %308 = arith.mulf %303, %307 : vector<8x1xf32>
    %309 = vector.extract_strided_slice %19 {offsets = [0, 0, 0], sizes = [1, 8, 32], strides = [1, 1, 1]} : vector<2x8x32xf32> to vector<1x8x32xf32>
    %310 = vector.shape_cast %309 : vector<1x8x32xf32> to vector<8x32xf32>
    %311 = vector.extract_strided_slice %310 {offsets = [0, 24], sizes = [8, 8], strides = [1, 1]} : vector<8x32xf32> to vector<8x8xf32>
    %312 = vector.broadcast %308 : vector<8x1xf32> to vector<8x8xf32>
    %313 = arith.mulf %312, %311 : vector<8x8xf32>
    %314 = arith.mulf %305, %307 : vector<8x1xf32>
    %315 = vector.extract_strided_slice %19 {offsets = [1, 0, 0], sizes = [1, 8, 32], strides = [1, 1, 1]} : vector<2x8x32xf32> to vector<1x8x32xf32>
    %316 = vector.shape_cast %315 : vector<1x8x32xf32> to vector<8x32xf32>
    %317 = vector.extract_strided_slice %316 {offsets = [0, 24], sizes = [8, 8], strides = [1, 1]} : vector<8x32xf32> to vector<8x8xf32>
    %318 = vector.broadcast %314 : vector<8x1xf32> to vector<8x8xf32>
    %319 = arith.mulf %318, %317 : vector<8x8xf32>
    %320 = arith.addf %313, %319 : vector<8x8xf32>
    %c1_42 = arith.constant 1 : index
    %c0_43 = arith.constant 0 : index
    %c24_44 = arith.constant 24 : index
    %321 = vector.load %arg20[%c1_42, %c0_43, %c24_44] : memref<2x8x32xf32, #tpu.memory_space<vmem>>, vector<1x8x8xf32>
    %322 = vector.shape_cast %321 : vector<1x8x8xf32> to vector<8x8xf32>
    %323 = vector.shape_cast %320 : vector<8x8xf32> to vector<1x8x8xf32>
    tpu.vector_store %arg20[%c1_42, %c0_43, %c24_44], %323 {strides = array<i32>} : memref<2x8x32xf32, #tpu.memory_space<vmem>>, vector<1x8x8xf32>,
    %c0_45 = arith.constant 0 : index
    %c0_46 = arith.constant 0 : index
    %c0_47 = arith.constant 0 : index
    %324 = vector.load %arg20[%c0_45, %c0_46, %c0_47] : memref<2x8x32xf32, #tpu.memory_space<vmem>>, vector<2x8x32xf32>
    %325 = vector.shape_cast %324 : vector<2x8x32xf32> to vector<16x32xf32>
    %326 = arith.truncf %325 : vector<16x32xf32> to vector<16x32xbf16>
    %c0_48 = arith.constant 0 : index
    %c0_49 = arith.constant 0 : index
    %c0_50 = arith.constant 0 : index
    %327 = vector.load %arg6[%c0_48, %c0_49, %c0_50] : memref<1x32x32xbf16, #tpu.memory_space<vmem>>, vector<1x32x32xbf16>
    %328 = vector.shape_cast %327 : vector<1x32x32xbf16> to vector<32x32xbf16>
    %cst_51 = arith.constant dense<0.000000e+00> : vector<16x32xf32>
    %329 = tpu.matmul %326, %328, %cst_51 {dimension_numbers = #tpu.dot_dimension_numbers<[1], [0], [0], [1], [0, 0, 1, 1], [], []>} : vector<16x32xbf16>, vector<32x32xbf16>, vector<16x32xf32> -> vector<16x32xf32>
    %c0_52 = arith.constant 0 : index
    %c0_53 = arith.constant 0 : index
    %c0_54 = arith.constant 0 : index
    %330 = vector.load %arg7[%c0_52, %c0_53, %c0_54] : memref<1x1x32xf32, #tpu.memory_space<vmem>>, vector<1x1x32xf32>
    %331 = vector.shape_cast %330 : vector<1x1x32xf32> to vector<1x32xf32>
    %332 = vector.broadcast %331 : vector<1x32xf32> to vector<16x32xf32>
    %333 = arith.addf %329, %332 : vector<16x32xf32>
    %334 = arith.addf %3, %333 : vector<16x32xf32>
    %c0_55 = arith.constant 0 : index
    %c0_56 = arith.constant 0 : index
    %c0_57 = arith.constant 0 : index
    %335 = vector.load %arg8[%c0_55, %c0_56, %c0_57] : memref<1x1x32xf32, #tpu.memory_space<vmem>>, vector<1x1x32xf32>
    %336 = vector.shape_cast %335 : vector<1x1x32xf32> to vector<1x32xf32>
    %c0_58 = arith.constant 0 : index
    %c0_59 = arith.constant 0 : index
    %c0_60 = arith.constant 0 : index
    %337 = vector.load %arg9[%c0_58, %c0_59, %c0_60] : memref<1x1x32xf32, #tpu.memory_space<vmem>>, vector<1x1x32xf32>
    %338 = vector.shape_cast %337 : vector<1x1x32xf32> to vector<1x32xf32>
    %cst_61 = arith.constant dense<0.000000e+00> : vector<16xf32>
    %339 = vector.multi_reduction <add>, %334, %cst_61 [1] : vector<16x32xf32> to vector<16xf32>
    %340 = vector.shape_cast %339 : vector<16xf32> to vector<16x1xf32>
    %cst_62 = arith.constant 3.200000e+01 : f32
    %341 = vector.broadcast %cst_62 : f32 to vector<16x1xf32>
    %342 = arith.divf %340, %341 : vector<16x1xf32>
    %343 = vector.broadcast %342 : vector<16x1xf32> to vector<16x32xf32>
    %344 = arith.subf %334, %343 : vector<16x32xf32>
    %345 = arith.mulf %344, %344 : vector<16x32xf32>
    %cst_63 = arith.constant dense<0.000000e+00> : vector<16xf32>
    %346 = vector.multi_reduction <add>, %345, %cst_63 [1] : vector<16x32xf32> to vector<16xf32>
    %347 = vector.shape_cast %346 : vector<16xf32> to vector<16x1xf32>
    %cst_64 = arith.constant 3.200000e+01 : f32
    %348 = vector.broadcast %cst_64 : f32 to vector<16x1xf32>
    %349 = arith.divf %347, %348 : vector<16x1xf32>
    %350 = vector.broadcast %342 : vector<16x1xf32> to vector<16x32xf32>
    %351 = arith.subf %334, %350 : vector<16x32xf32>
    %cst_65 = arith.constant 9.99999974E-6 : f32
    %352 = vector.broadcast %cst_65 : f32 to vector<16x1xf32>
    %353 = arith.addf %349, %352 : vector<16x1xf32>
    %354 = math.rsqrt %353 : vector<16x1xf32>
    %355 = vector.broadcast %354 : vector<16x1xf32> to vector<16x32xf32>
    %356 = arith.mulf %351, %355 : vector<16x32xf32>
    %357 = vector.broadcast %336 : vector<1x32xf32> to vector<16x32xf32>
    %358 = arith.mulf %356, %357 : vector<16x32xf32>
    %359 = vector.broadcast %338 : vector<1x32xf32> to vector<16x32xf32>
    %360 = arith.addf %358, %359 : vector<16x32xf32>
    %361 = arith.truncf %360 : vector<16x32xf32> to vector<16x32xbf16>
    %c0_66 = arith.constant 0 : index
    %c0_67 = arith.constant 0 : index
    %c0_68 = arith.constant 0 : index
    %362 = vector.load %arg10[%c0_66, %c0_67, %c0_68] : memref<1x32x64xbf16, #tpu.memory_space<vmem>>, vector<1x32x64xbf16>
    %363 = vector.shape_cast %362 : vector<1x32x64xbf16> to vector<32x64xbf16>
    %cst_69 = arith.constant dense<0.000000e+00> : vector<16x64xf32>
    %364 = tpu.matmul %361, %363, %cst_69 {dimension_numbers = #tpu.dot_dimension_numbers<[1], [0], [0], [1], [0, 0, 1, 1], [], []>} : vector<16x32xbf16>, vector<32x64xbf16>, vector<16x64xf32> -> vector<16x64xf32>
    %c0_70 = arith.constant 0 : index
    %c0_71 = arith.constant 0 : index
    %c0_72 = arith.constant 0 : index
    %365 = vector.load %arg11[%c0_70, %c0_71, %c0_72] : memref<1x1x64xf32, #tpu.memory_space<vmem>>, vector<1x1x64xf32>
    %366 = vector.shape_cast %365 : vector<1x1x64xf32> to vector<1x64xf32>
    %367 = vector.broadcast %366 : vector<1x64xf32> to vector<16x64xf32>
    %368 = arith.addf %364, %367 : vector<16x64xf32>
    %cst_73 = arith.constant 0.000000e+00 : f32
    %369 = vector.broadcast %cst_73 : f32 to vector<16x64xf32>
    %370 = arith.maximumf %368, %369 : vector<16x64xf32>
    %371 = arith.truncf %370 : vector<16x64xf32> to vector<16x64xbf16>
    %c0_74 = arith.constant 0 : index
    %c0_75 = arith.constant 0 : index
    %c0_76 = arith.constant 0 : index
    %372 = vector.load %arg12[%c0_74, %c0_75, %c0_76] : memref<1x64x32xbf16, #tpu.memory_space<vmem>>, vector<1x64x32xbf16>
    %373 = vector.shape_cast %372 : vector<1x64x32xbf16> to vector<64x32xbf16>
    %cst_77 = arith.constant dense<0.000000e+00> : vector<16x32xf32>
    %374 = tpu.matmul %371, %373, %cst_77 {dimension_numbers = #tpu.dot_dimension_numbers<[1], [0], [0], [1], [0, 0, 1, 1], [], []>} : vector<16x64xbf16>, vector<64x32xbf16>, vector<16x32xf32> -> vector<16x32xf32>
    %c0_78 = arith.constant 0 : index
    %c0_79 = arith.constant 0 : index
    %c0_80 = arith.constant 0 : index
    %375 = vector.load %arg13[%c0_78, %c0_79, %c0_80] : memref<1x1x32xf32, #tpu.memory_space<vmem>>, vector<1x1x32xf32>
    %376 = vector.shape_cast %375 : vector<1x1x32xf32> to vector<1x32xf32>
    %377 = vector.broadcast %376 : vector<1x32xf32> to vector<16x32xf32>
    %378 = arith.addf %374, %377 : vector<16x32xf32>
    %379 = arith.addf %360, %378 : vector<16x32xf32>
    %c0_81 = arith.constant 0 : index
    %c0_82 = arith.constant 0 : index
    %c0_83 = arith.constant 0 : index
    %380 = vector.load %arg14[%c0_81, %c0_82, %c0_83] : memref<1x1x32xf32, #tpu.memory_space<vmem>>, vector<1x1x32xf32>
    %381 = vector.shape_cast %380 : vector<1x1x32xf32> to vector<1x32xf32>
    %c0_84 = arith.constant 0 : index
    %c0_85 = arith.constant 0 : index
    %c0_86 = arith.constant 0 : index
    %382 = vector.load %arg15[%c0_84, %c0_85, %c0_86] : memref<1x1x32xf32, #tpu.memory_space<vmem>>, vector<1x1x32xf32>
    %383 = vector.shape_cast %382 : vector<1x1x32xf32> to vector<1x32xf32>
    %cst_87 = arith.constant dense<0.000000e+00> : vector<16xf32>
    %384 = vector.multi_reduction <add>, %379, %cst_87 [1] : vector<16x32xf32> to vector<16xf32>
    %385 = vector.shape_cast %384 : vector<16xf32> to vector<16x1xf32>
    %cst_88 = arith.constant 3.200000e+01 : f32
    %386 = vector.broadcast %cst_88 : f32 to vector<16x1xf32>
    %387 = arith.divf %385, %386 : vector<16x1xf32>
    %388 = vector.broadcast %387 : vector<16x1xf32> to vector<16x32xf32>
    %389 = arith.subf %379, %388 : vector<16x32xf32>
    %390 = arith.mulf %389, %389 : vector<16x32xf32>
    %cst_89 = arith.constant dense<0.000000e+00> : vector<16xf32>
    %391 = vector.multi_reduction <add>, %390, %cst_89 [1] : vector<16x32xf32> to vector<16xf32>
    %392 = vector.shape_cast %391 : vector<16xf32> to vector<16x1xf32>
    %cst_90 = arith.constant 3.200000e+01 : f32
    %393 = vector.broadcast %cst_90 : f32 to vector<16x1xf32>
    %394 = arith.divf %392, %393 : vector<16x1xf32>
    %395 = vector.broadcast %387 : vector<16x1xf32> to vector<16x32xf32>
    %396 = arith.subf %379, %395 : vector<16x32xf32>
    %cst_91 = arith.constant 9.99999974E-6 : f32
    %397 = vector.broadcast %cst_91 : f32 to vector<16x1xf32>
    %398 = arith.addf %394, %397 : vector<16x1xf32>
    %399 = math.rsqrt %398 : vector<16x1xf32>
    %400 = vector.broadcast %399 : vector<16x1xf32> to vector<16x32xf32>
    %401 = arith.mulf %396, %400 : vector<16x32xf32>
    %402 = vector.broadcast %381 : vector<1x32xf32> to vector<16x32xf32>
    %403 = arith.mulf %401, %402 : vector<16x32xf32>
    %404 = vector.broadcast %383 : vector<1x32xf32> to vector<16x32xf32>
    %405 = arith.addf %403, %404 : vector<16x32xf32>
    %c0_92 = arith.constant 0 : index
    %c0_93 = arith.constant 0 : index
    %406 = vector.load %arg19[%c0_92, %c0_93] : memref<16x32xf32, #tpu.memory_space<vmem>>, vector<16x32xf32>
    tpu.vector_store %arg19[%c0_92, %c0_93], %405 {strides = array<i32>} : memref<16x32xf32, #tpu.memory_space<vmem>>, vector<16x32xf32>,
    %c1_i32 = arith.constant 1 : i32
    %407 = arith.cmpi eq, %arg1, %c1_i32 : i32
    %408 = arith.extui %407 : i1 to i32
    %c0_i32_94 = arith.constant 0 : i32
    %409 = arith.cmpi ne, %408, %c0_i32_94 : i32
    scf.if %409 {
      %410 = arith.truncf %405 : vector<16x32xf32> to vector<16x32xbf16>
      %c0_95 = arith.constant 0 : index
      %c0_96 = arith.constant 0 : index
      %411 = vector.load %arg16[%c0_95, %c0_96] : memref<32x128xbf16, #tpu.memory_space<vmem>>, vector<32x128xbf16>
      %cst_97 = arith.constant dense<0.000000e+00> : vector<16x128xf32>
      %412 = tpu.matmul %410, %411, %cst_97 {dimension_numbers = #tpu.dot_dimension_numbers<[1], [0], [0], [1], [0, 0, 1, 1], [], []>} : vector<16x32xbf16>, vector<32x128xbf16>, vector<16x128xf32> -> vector<16x128xf32>
      %c0_98 = arith.constant 0 : index
      %c0_99 = arith.constant 0 : index
      %413 = vector.load %arg17[%c0_98, %c0_99] : memref<1x128xf32, #tpu.memory_space<vmem>>, vector<1x128xf32>
      %414 = vector.broadcast %413 : vector<1x128xf32> to vector<16x128xf32>
      %415 = arith.addf %412, %414 : vector<16x128xf32>
      %416 = vector.shape_cast %415 : vector<16x128xf32> to vector<2x8x128xf32>
      %c0_100 = arith.constant 0 : index
      %c0_101 = arith.constant 0 : index
      %c0_102 = arith.constant 0 : index
      %417 = vector.load %arg18[%c0_100, %c0_101, %c0_102] : memref<2x8x128xf32, #tpu.memory_space<vmem>>, vector<2x8x128xf32>
      tpu.vector_store %arg18[%c0_100, %c0_101, %c0_102], %416 {strides = array<i32>} : memref<2x8x128xf32, #tpu.memory_space<vmem>>, vector<2x8x128xf32>,
    } else {
    }
    return
  }
  func.func @transform_0(%arg0: i32, %arg1: i32) -> (i32, i32, i32) {
    %c0_i32 = arith.constant 0 : i32
    %c0_i32_0 = arith.constant 0 : i32
    %c0_i32_1 = arith.constant 0 : i32
    return %c0_i32, %arg0, %c0_i32_0 : i32, i32, i32
  }
  func.func @transform_1(%arg0: i32, %arg1: i32) -> (i32, i32, i32) {
    %c0_i32 = arith.constant 0 : i32
    %c0_i32_0 = arith.constant 0 : i32
    %c0_i32_1 = arith.constant 0 : i32
    return %c0_i32, %arg0, %c0_i32_0 : i32, i32, i32
  }
  func.func @transform_2(%arg0: i32, %arg1: i32) -> (i32, i32, i32) {
    %c0_i32 = arith.constant 0 : i32
    %c0_i32_0 = arith.constant 0 : i32
    %c0_i32_1 = arith.constant 0 : i32
    return %arg1, %c0_i32, %c0_i32_0 : i32, i32, i32
  }
  func.func @transform_3(%arg0: i32, %arg1: i32) -> (i32, i32, i32) {
    %c0_i32 = arith.constant 0 : i32
    %c0_i32_0 = arith.constant 0 : i32
    %c0_i32_1 = arith.constant 0 : i32
    return %arg1, %c0_i32, %c0_i32_0 : i32, i32, i32
  }
  func.func @transform_4(%arg0: i32, %arg1: i32) -> (i32, i32, i32) {
    %c0_i32 = arith.constant 0 : i32
    %c0_i32_0 = arith.constant 0 : i32
    %c0_i32_1 = arith.constant 0 : i32
    return %arg1, %c0_i32, %c0_i32_0 : i32, i32, i32
  }
  func.func @transform_5(%arg0: i32, %arg1: i32) -> (i32, i32, i32) {
    %c0_i32 = arith.constant 0 : i32
    %c0_i32_0 = arith.constant 0 : i32
    %c0_i32_1 = arith.constant 0 : i32
    return %arg1, %c0_i32, %c0_i32_0 : i32, i32, i32
  }
  func.func @transform_6(%arg0: i32, %arg1: i32) -> (i32, i32, i32) {
    %c0_i32 = arith.constant 0 : i32
    %c0_i32_0 = arith.constant 0 : i32
    %c0_i32_1 = arith.constant 0 : i32
    return %arg1, %c0_i32, %c0_i32_0 : i32, i32, i32
  }
  func.func @transform_7(%arg0: i32, %arg1: i32) -> (i32, i32, i32) {
    %c0_i32 = arith.constant 0 : i32
    %c0_i32_0 = arith.constant 0 : i32
    %c0_i32_1 = arith.constant 0 : i32
    return %arg1, %c0_i32, %c0_i32_0 : i32, i32, i32
  }
  func.func @transform_8(%arg0: i32, %arg1: i32) -> (i32, i32, i32) {
    %c0_i32 = arith.constant 0 : i32
    %c0_i32_0 = arith.constant 0 : i32
    %c0_i32_1 = arith.constant 0 : i32
    return %arg1, %c0_i32, %c0_i32_0 : i32, i32, i32
  }
  func.func @transform_9(%arg0: i32, %arg1: i32) -> (i32, i32, i32) {
    %c0_i32 = arith.constant 0 : i32
    %c0_i32_0 = arith.constant 0 : i32
    %c0_i32_1 = arith.constant 0 : i32
    return %arg1, %c0_i32, %c0_i32_0 : i32, i32, i32
  }
  func.func @transform_10(%arg0: i32, %arg1: i32) -> (i32, i32, i32) {
    %c0_i32 = arith.constant 0 : i32
    %c0_i32_0 = arith.constant 0 : i32
    %c0_i32_1 = arith.constant 0 : i32
    return %arg1, %c0_i32, %c0_i32_0 : i32, i32, i32
  }
  func.func @transform_11(%arg0: i32, %arg1: i32) -> (i32, i32, i32) {
    %c0_i32 = arith.constant 0 : i32
    %c0_i32_0 = arith.constant 0 : i32
    %c0_i32_1 = arith.constant 0 : i32
    return %arg1, %c0_i32, %c0_i32_0 : i32, i32, i32
  }
  func.func @transform_12(%arg0: i32, %arg1: i32) -> (i32, i32, i32) {
    %c0_i32 = arith.constant 0 : i32
    %c0_i32_0 = arith.constant 0 : i32
    %c0_i32_1 = arith.constant 0 : i32
    return %arg1, %c0_i32, %c0_i32_0 : i32, i32, i32
  }
  func.func @transform_13(%arg0: i32, %arg1: i32) -> (i32, i32, i32) {
    %c0_i32 = arith.constant 0 : i32
    %c0_i32_0 = arith.constant 0 : i32
    %c0_i32_1 = arith.constant 0 : i32
    return %arg1, %c0_i32, %c0_i32_0 : i32, i32, i32
  }
  func.func @transform_14(%arg0: i32, %arg1: i32) -> (i32, i32) {
    %c0_i32 = arith.constant 0 : i32
    %c0_i32_0 = arith.constant 0 : i32
    %c0_i32_1 = arith.constant 0 : i32
    return %c0_i32, %c0_i32_0 : i32, i32
  }
  func.func @transform_15(%arg0: i32, %arg1: i32) -> (i32, i32) {
    %c0_i32 = arith.constant 0 : i32
    %c0_i32_0 = arith.constant 0 : i32
    %c0_i32_1 = arith.constant 0 : i32
    return %c0_i32, %c0_i32_0 : i32, i32
  }
  func.func @transform_16(%arg0: i32, %arg1: i32) -> (i32, i32, i32) {
    %c0_i32 = arith.constant 0 : i32
    %c0_i32_0 = arith.constant 0 : i32
    %c0_i32_1 = arith.constant 0 : i32
    return %c0_i32, %arg0, %c0_i32_0 : i32, i32, i32
  }
}

</mosaic_0001>

<bundles_post_ra>
// kernel: tpu_custom_call.1
= control target key start
LH: loop header
LB: loop body
LE: loop exit
PB: predicated region body
PF: predicated region fallthrough
CT: control target
= control target key end

     0   :  { %s3130_s0 = inlined_call_operand.vmem [shape: f32[2,16,32], index: 0, kind: input, shape index: {}]   ;;  %s3131_s1 = inlined_call_operand.hbm [shape: f32[1,16,32], index: 1, kind: input, shape index: {}]   ;;  %s3132_s2 = inlined_call_operand.vmem [shape: bf16[2,32,96], index: 2, kind: input, shape index: {}]   ;;  %s3133_s3 = inlined_call_operand.hbm [shape: f32[2,1,96], index: 3, kind: input, shape index: {}]   ;;  %s3134_s4 = inlined_call_operand.vmem [shape: bf16[2,32,32], index: 4, kind: input, shape index: {}]   ;;  %s3135_s5 = inlined_call_operand.vmem [shape: f32[2,1,32], index: 5, kind: input, shape index: {}]   ;;  %s3136_s6 = inlined_call_operand.vmem [shape: f32[2,1,32], index: 6, kind: input, shape index: {}]   ;;  %s3137_s7 = inlined_call_operand.hbm [shape: f32[2,1,32], index: 7, kind: input, shape index: {}]   ;;  %s3138_s8 = inlined_call_operand.hbm [shape: bf16[2,32,64], index: 8, kind: input, shape index: {}]   ;;  %s3139_s9 = inlined_call_operand.vmem [shape: f32[2,1,64], index: 9, kind: input, shape index: {}]   ;;  %s3140_s10 = inlined_call_operand.vmem [shape: bf16[2,64,32], index: 10, kind: input, shape index: {}]   ;;  %s3141_s11 = inlined_call_operand.vmem [shape: f32[2,1,32], index: 11, kind: input, shape index: {}]   ;;  %s3142_s12 = inlined_call_operand.vmem [shape: f32[2,1,32], index: 12, kind: input, shape index: {}]   ;;  %s3143_s13 = inlined_call_operand.hbm [shape: f32[2,1,32], index: 13, kind: input, shape index: {}]   ;;  %s3144_s14 = inlined_call_operand.hbm [shape: bf16[32,128], index: 14, kind: input, shape index: {}]   ;;  %s3145_s15 = inlined_call_operand.vmem [shape: f32[1,128], index: 15, kind: input, shape index: {}]   ;;  %s3146_s16 = inlined_call_operand.hbm [shape: f32[2,16,128], index: 16, kind: output, shape index: {}]  }
   0x1   :  { %3166 = sst [smem:[#allocation37_spill]] %s3130_s0 }
   0x2   :  { %3167 = sst [smem:[#allocation38_spill]] %s3131_s1 }
   0x3   :  { %3168 = sst [smem:[#allocation39_spill]] %s3132_s2 }
   0x4   :  { %3169 = sst [smem:[#allocation40_spill]] %s3133_s3 }
   0x5   :  { %3170 = sst [smem:[#allocation41_spill]] %s3134_s4 }
   0x6   :  { %3171 = sst [smem:[#allocation42_spill]] %s3135_s5 }
   0x7   :  { %3172 = sst [smem:[#allocation43_spill]] %s3136_s6 }
   0x8   :  { %3173 = sst [smem:[#allocation44_spill]] %s3137_s7 }
   0x9   :  { %3174 = sst [smem:[#allocation45_spill]] %s3138_s8 }
   0xa   :  { %3175 = sst [smem:[#allocation46_spill]] %s3139_s9 }
   0xb   :  { %3176 = sst [smem:[#allocation47_spill]] %s3140_s10 }
   0xc   :  { %3177 = sst [smem:[#allocation48_spill]] %s3141_s11 }
   0xd   :  { %3178 = sst [smem:[#allocation49_spill]] %s3142_s12 }
   0xe   :  { %3179 = sst [smem:[#allocation50_spill]] %s3143_s13 }
   0xf   :  { %3180 = sst [smem:[#allocation51_spill]] %s3144_s14 }
  0x10   :  { %3181 = sst [smem:[#allocation52_spill]] %s3145_s15 }
  0x11   :  { %3182 = sst [smem:[#allocation53_spill]] %s3146_s16 }
  0x12   :  { %21 = vsyncpa [#allocation6], 0 }
  0x13   :  { %23 = vsyncpa [#allocation6 + $0x1], 0 }
  0x14   :  { %24 = vsyncpa [#allocation9], 0 }
  0x15   :  { %26 = vsyncpa [#allocation9 + $0x1], 0 }
  0x16   :  { %27 = vsyncpa [#allocation12], 0 }
  0x17   :  { %29 = vsyncpa [#allocation12 + $0x1], 0 }
  0x18   :  { %30 = vsyncpa [#allocation15], 0 }
  0x19   :  { %31 = vsyncpa [#allocation7], 0 }
  0x1a   :  { %33 = vsyncpa [#allocation7 + $0x1], 0  ;;  %s2601_s21 = smov 0   ;;  %s2603_s22 = smov 0  }
  0x1b   :  { %s2605_s23 = smov 0   ;;  %s2607_s24 = smov 0  }
  0x1c   :  { %s2609_s25 = smov 0   ;;  %s2611_s26 = smov 0  }
  0x1d   :  { %s2613_s27 = smov 0   ;;  %s2615_s28 = smov 0  }
  0x1e   :  { %s2617_s29 = smov 0   ;;  %s2619_s30 = smov 0  }
  0x1f   :  { %s2621_s0 = smov 0  }
  0x20 LB: > { %3183 = sst [smem:[#allocation22_spill]] %s2468_s23  ;;  %s2657_s17 = sadd.s32 4294967295, %s2500_s0   ;;  %s2500_s0 = sphi %s2621_s0, %s39_s0   ;;  %s2496_s30 = sphi %s2619_s30, %s3252_s30   ;;  %s2492_s29 = sphi %s2617_s29, %s3251_s29   ;;  %s2488_s28 = sphi %s2615_s28, %s3250_s28   ;;  %s2484_s27 = sphi %s2613_s27, %s3249_s27   ;;  %s2480_s26 = sphi %s2611_s26, %s3248_s26   ;;  %s2476_s25 = sphi %s2609_s25, %s3247_s25   ;;  %s2472_s24 = sphi %s2607_s24, %s3246_s24   ;;  %s2468_s23 = sphi %s2605_s23, %s3245_s23   ;;  %s2464_s22 = sphi %s2603_s22, %s3254_s22   ;;  %s2460_s21 = sphi %s2601_s21, %s3253_s21  }
  0x21   : > { %3184 = sst [smem:[#allocation23_spill]] %s2472_s24  ;;  %s1902_s18 = sadd.s32 4294967294, %s2500_s0  }
  0x22   : > { %3185 = sst [smem:[#allocation24_spill]] %s2476_s25  ;;  %s48_s19 = sadd.s32 1, %s2492_s29 }
  0x23   : > { %3186 = sst [smem:[#allocation25_spill]] %s2480_s26  ;;  %s51_s20 = sadd.s32 1, %s2496_s30 }
  0x24   : > { %3187 = sst [smem:[#allocation26_spill]] %s2484_s27  ;;  %p49_p0 = scmp.ge.s32.totalorder %s48_s19, 2 }
  0x25   : > { %3188 = sst [smem:[#allocation27_spill]] %s2488_s28  ;;  %s58_s16 = sadd.s32 1, %s2480_s26 }
  0x26   : > { %3189 = sst [smem:[#allocation28_spill]] %s2492_s29  ;;  %p3150_p1 = scmp.ne.s32.totalorder %s2480_s26, %s2476_s25 }
  0x27   : > { %3190 = sst [smem:[#allocation29_spill]] %s2496_s30  ;;  %p66_p2 = scmp.eq.s32.totalorder %s2500_s0, 0 }
  0x28   : > { %3191 = sst [smem:[#allocation30_spill]] %s2500_s0  ;;  %s3256_s19 = smov (%p49_p0, %s48_s19), 0 }
  0x29   : > { %3192 = sst [smem:[#allocation31_spill]] %s3256_s19  ;;  %s3258_s20 = smov (!%p49_p0, %s51_s20), %s2496_s30 }
  0x2a   : > { %p2674_p3 = por %p66_p2, %p3150_p1  ;;  %p3149_p4 = scmp.ne.s32.totalorder %s2476_s25, %s2472_s24 }
  0x2b   : > { %p53_p5 = scmp.ge.s32.totalorder %s3258_s20, 2  ;;  %p98_p6 = scmp.eq.s32.totalorder %s2657_s17, 0 }
  0x2c   : > { %s3193_s28 = scalar_select %p2674_p3, 1, 0 }
  0x2d   : > { %s133_s15 = ssub.s32 %s2492_s29, %s3256_s19  ;;  %s136_s12 = sadd.s32 1, %s2468_s23 }
  0x2e   : > { %s3260_s20 = smov (%p53_p5, %s3258_s20), 0  ;;  %p2691_p7 = por %p98_p6, %p3149_p4 }
  0x2f   : > { %3194 = sst [smem:[#allocation32_spill]] %s3260_s20  ;;  %p134_p8 = scmp.eq.s32.totalorder %s133_s15, 0 }
  0x30   : > { %s3195_s10 = scalar_select %p2691_p7, 1, 0 }
  0x31   : > { %s55_s11 = ssub.s32 %s2496_s30, %s3260_s20  ;;  %p143_p9 = scmp.ne.s32.totalorder %s2468_s23, %s2464_s22 }
  0x32   : > { %p56_p10 = scmp.eq.s32.totalorder %s55_s11, 0  ;;  %p149_p11 = scmp.ne.s32.totalorder %s2464_s22, %s2460_s21 }
  0x33   : > { %s2702_s19 = scalar_select %p134_p8, %s2468_s23, %s136_s12  }
  0x34   : > { %s2705_s9 = scalar_select %p56_p10, %s2480_s26, %s58_s16  }
  0x35   : > { %3196 = sst [smem:[#allocation33_spill]] %s2702_s19  ;;  %p2709_p12 = por %p143_p9, %p66_p2 }
  0x36   : > { %3197 = sst [smem:[#allocation34_spill]] %s2705_s9  ;;  %p2715_p13 = por %p149_p11, %p98_p6 }
  0x37   : > { %p475_p0 = scmp.eq.s32.totalorder %s2657_s17, 3  ;;  %p481_p5 = scmp.eq.s32.totalorder %s1902_s18, 3 }
  0x38   : > { %p1903_p4 = scmp.ge.s32.totalorder %s2500_s0, 1  ;;  %p488_p1 = scmp.lt.s32.totalorder %s2500_s0, 5 }
  0x39   : > { %p3200_p7 = scmp.ne.s32.totalorder %s2480_s26, %s2476_s25  ;;  %p3203_p10 = scmp.ne.s32.totalorder %s2476_s25, %s2472_s24 }
  0x3a   : > { %p2736_p2 = pnand %p1903_p4, %p488_p1  ;;  %s3207_s14 = sld [smem:[#allocation51_spill]] }
  0x3b   : > { %p2725_p8 = por %p475_p0, %p3200_p7  ;;  %p2732_p3 = por %p481_p5, %p3203_p10 }
  0x3c   : > { %p2016_p9 = pneg %p2736_p2  ;;  %s2502_s20 = smov [#allocation14]  }
  0x3d   : > { %s3201_s11 = scalar_select %p2725_p8, 1, 0 }
  0x3e   : > { %s3204_s12 = scalar_select %p2732_p3, 1, 0 }
  0x3f   : > { %3202 = sst [smem:[#allocation35_spill]] %s3201_s11  ;;  %s501_s9 = sshll.u32 %s2502_s20, 4  ;;  %s502_s9 = int_to_ptr.vmem [resolvable:$true] %s501_s9 }
  0x40   : > { %3205 = sst [smem:[#allocation36_spill]] %s3204_s12  ;;  %s499_s18 = sshll.u32 %s3207_s14, 4  ;;  %s500_s18 = int_to_ptr.hbm [resolvable:$true] %s499_s18 }
  0x41   : > { %p2017_p7 = pnand %p2016_p9, %p98_p6  ;;  %s2503_s19 = smov 64  }
  0x42   : > { %s2504_s24 = smov 4   ;;  %p1905_p1 = scmp.ge.s32.totalorder %s2500_s0, 4 }
  0x43   : > { %2019 = dma.hbm_to_vmem [thread:$0]  (!%p2017_p7), %s500_s18, 256, %s502_s9, [#allocation15], %s2503_s19, %s2503_s19, %s2504_s24  }
  0x44   : > { %514 = sbr.rel (%p1905_p1) target bundleno = 113 (0x71), region = 24  ;;  %p3208_p4 = scmp.ne.s32.totalorder (!%p1905_p1), %s3193_s28, 0 }
  0x49   : > { %517 = sbr.rel (!%p3208_p4) target bundleno = 85 (0x55), region = 28  ;;  %s519_s16 = sand.u32 (%p3208_p4), 1, %s2480_s26  }
  0x4a   : > { %s1907_s21 = sshll.u32 (%p3208_p4), %s2496_s30, 3  ;;  %s1906_s14 = sshll.u32 (%p3208_p4), %s519_s16, 4 }
  0x4b   : > { %s3209_s20 = sld [smem:[#allocation37_spill]] (%p3208_p4)  ;;  %s521_s5 = scalar_lea.vmem (%p3208_p4), [#allocation4], %s1906_s14 }
  0x51   : > { %s523_s2 = scalar_lea.vmem %s3209_s20, %s1907_s21 }
  0x52   : > { %v554_v0 = vld [vmem:[%s523_s2] sm:$0xff]  ;;  %v556_v1 = vld [vmem:[%s523_s2 + $0x10] sm:$0xff] }
  0x53   : > { %555 = vst [vmem:[%s521_s5] sm:$0xff] %v554_v0 }
  0x54   : > { %557 = vst [vmem:[%s521_s5 + $0x8] sm:$0xff] %v556_v1 }
  0x55 PF: > { %s591_s9 = sand.u32 1, %s2500_s0   ;;  %s2757_s24 = sand.u32 1, %s2468_s23  }
  0x56   : > { %s3210_s3 = sld [smem:[#allocation40_spill]]  ;;  %s594_s12 = scalar_lea.vmem [#allocation8], %s2757_s24 }
  0x57   : > { %s601_s2 = sshll.u32 %s594_s12, 4  ;;  %s2764_s5 = scalar_lea.sflag [#allocation9], %s591_s9  ;;  %s602_s2 = int_to_ptr.vmem [resolvable:$true] %s601_s2 }
  0x58   : > { %s1910_s16 = sshll.u32 %s2757_s24, 4  ;;  %s1984_s21 = sshll.u32 %s2492_s29, 4 }
  0x59   : > { %s3211_s8 = sld [smem:[#allocation45_spill]]  ;;  %s649_s23 = scalar_lea.vmem [#allocation11], %s1910_s16 }
  0x5a   : > { %s657_s12 = sshll.u32 %s649_s23, 4  ;;  %s2505_s0 = smov 64   ;;  %s658_s12 = int_to_ptr.vmem [resolvable:$true] %s657_s12 }
  0x5b   : > { %s2506_s27 = smov 4   ;;  %s3212_s1 = sld [smem:[#allocation38_spill]] }
  0x5c   : > { %s597_s11 = scalar_lea.hbm %s3210_s3, %s2492_s29  ;;  %p3213_p11 = scmp.ne.s32.totalorder %s3193_s28, 0 }
  0x5d   : > { %s599_s14 = sshll.u32 %s597_s11, 4  ;;  %s2774_s11 = scalar_lea.sflag [#allocation12], %s591_s9  ;;  %s600_s14 = int_to_ptr.hbm [resolvable:$true] %s599_s14 }
  0x5e   : > { %2003 = dma.hbm_to_vmem [thread:$0]  (%p2709_p12), %s600_s14, 16, %s602_s2, %s2764_s5  }
  0x5f   : > { %s654_s18 = scalar_lea.hbm %s3211_s8, %s1984_s21  ;;  %s564_s2 = sand.u32 1, %s2480_s26  }
  0x60   : > { %s655_s3 = sshll.u32 %s654_s18, 4  ;;  %s1909_s14 = sshll.u32 %s2496_s30, 3  ;;  %s656_s3 = int_to_ptr.hbm [resolvable:$true] %s655_s3 }
  0x61   : > { %2005 = dma.hbm_to_vmem [thread:$0]  (%p2709_p12), %s656_s3, 256, %s658_s12, %s2774_s11, %s2505_s0, %s2505_s0, %s2506_s27  }
  0x62   : > { %s1908_s21 = sshll.u32 %s564_s2, 3  ;;  %s572_s23 = scalar_lea.hbm %s3212_s1, %s1909_s14 }
  0x63   : > { %s574_s19 = sshll.u32 %s572_s23, 4  ;;  %s568_s9 = scalar_lea.vmem [#allocation5], %s1908_s21  ;;  %s575_s19 = int_to_ptr.hbm [resolvable:$true] %s574_s19 }
  0x64   : > { %s576_s18 = sshll.u32 %s568_s9, 4  ;;  %s565_s8 = scalar_lea.sflag [#allocation6], %s564_s2  ;;  %s577_s18 = int_to_ptr.vmem [resolvable:$true] %s576_s18 }
  0x65   : > { %2002 = dma.hbm_to_vmem [thread:$0]  (%p3213_p11), %s575_s19, 128, %s577_s18, %s565_s8  }
  0x66   : > { %s3214_s7 = sld [smem:[#allocation44_spill]]  ;;  %s631_s30 = scalar_lea.vmem [#allocation10], %s2757_s24 }
  0x67   : > { %s638_s20 = sshll.u32 %s631_s30, 4  ;;  %s3215_s13 = sld [smem:[#allocation50_spill]]  ;;  %s639_s20 = int_to_ptr.vmem [resolvable:$true] %s638_s20 }
  0x68   : > { %s696_s9 = scalar_lea.vmem [#allocation13], %s2757_s24 }
  0x69   : > { %s703_s2 = sshll.u32 %s696_s9, 4  ;;  %s704_s2 = int_to_ptr.vmem [resolvable:$true] %s703_s2 }
  0x6c   : > { %s634_s0 = scalar_lea.hbm %s3214_s7, %s2492_s29 }
  0x6d   : > { %s636_s12 = sshll.u32 %s634_s0, 4  ;;  %s699_s16 = scalar_lea.hbm %s3215_s13, %s2492_s29  ;;  %s637_s12 = int_to_ptr.hbm [resolvable:$true] %s636_s12 }
  0x6e   : > { %2004 = dma.hbm_to_vmem [thread:$0]  (%p2709_p12), %s637_s12, 16, %s639_s20, %s2764_s5  }
  0x6f   : > { %s701_s23 = sshll.u32 %s699_s16, 4  ;;  %s702_s23 = int_to_ptr.hbm [resolvable:$true] %s701_s23 }
  0x70   : > { %2006 = dma.hbm_to_vmem [thread:$0]  (%p2709_p12), %s702_s23, 16, %s704_s2, %s2774_s11  }
  0x71 PF: > { %712 = sbr.rel (%p2736_p2) target bundleno = 2024 (0x7e8), region = 118  ;;  %s2805_s8 = sand.u32 (!%p2736_p2), 1, %s2476_s25  }
  0x72   : > { %s3162_s28 = sshll.u32 (!%p2736_p2), %s2805_s8, 4  ;;  %s1915_s30 = sshll.u32 (!%p2736_p2), %s2805_s8, 3 }
  0x73   : > { %s2811_s24 = scalar_lea.vmem (!%p2736_p2), [#allocation4], %s3162_s28  ;;  %s722_s5 = scalar_lea.sflag (!%p2736_p2), [#allocation6], %s2805_s8 }
  0x74   : > { %s2814_s6 = scalar_lea.vmem (!%p2736_p2), [#allocation5], %s1915_s30  ;;  %p3216_p12 = scmp.ne.s32.totalorder (!%p2736_p2), %s3195_s10, 0 }
  0x76   : > { %2439 = dma.done.wait (%p3216_p12), %s722_s5, 128  }
  0x77   : > { %2441 = vsyncadd (%p3216_p12), %s722_s5, 4294967168  ;;  %s731_s15 = sand.u32 1, %s2657_s17   ;;  %s2822_s11 = sand.u32 1, %s2464_s22  }
  0x78   : > { %s732_s19 = scalar_lea.sflag [#allocation9], %s731_s15 }
  0x79   : > { %2443 = dma.done.wait (%p2715_p13), %s732_s19, 32  }
  0x7a   : > { %2445 = vsyncadd (%p2715_p13), %s732_s19, 4294967264  ;;  %s1916_s3 = sshll.u32 %s2822_s11, 4  ;;  %s750_s27 = scalar_lea.sflag [#allocation12], %s731_s15 }
  0x7b   : > { %s2831_s0 = scalar_lea.vmem [#allocation11], %s1916_s3 }
  0x7c   : > { %2447 = dma.done.wait (%p2715_p13), %s750_s27, 272  }
  0x7d   : > { %2449 = vsyncadd (%p2715_p13), %s750_s27, 4294967024 }
  0x7e   : > { %2451 = dma.done.wait (%p98_p6), [#allocation15], 256  }
  0x7f   : > { %2453 = vsyncadd (%p98_p6), [#allocation15], 4294967040  ;;  %s3217_s20 = sld [smem:[#allocation26_spill]]  ;;  %s3226_s10 = sshll.u32 %s2805_s8, 4 }
  0x80   : > { %s3219_s30 = sld [smem:[#allocation39_spill]] }
  0x81   : > { %s3220_s3 = sld [smem:[#allocation41_spill]] }
  0x82   : > { %s3221_s18 = sld [smem:[#allocation43_spill]] }
  0x83   : > { %s3222_s13 = sld [smem:[#allocation46_spill]] }
  0x84   : > { %s3223_s23 = sld [smem:[#allocation48_spill]] }
  0x85   : > { %p868_p0 = scmp.lt.s32.totalorder %s3217_s20, 1  ;;  %s3225_s19 = sld [smem:[#allocation49_spill]] }
  0x86   : > { %p1925_p6 = scmp.ne.s32.totalorder %s3217_s20, 0 }
  0x87   : > { %s2844_s14 = scalar_select %p868_p0, %s3217_s20, 1 }
  0x89   : > { %s1985_s4 = sshll.u32 %s2844_s14, 4  ;;  %s883_s28 = scalar_lea.vmem %s3221_s18, %s2844_s14 }
  0x8a   : > { %s872_s5 = scalar_lea.vmem %s3219_s30, %s1985_s4  ;;  %s2857_s27 = scalar_lea.vmem %s3220_s3, %s1985_s4 }
  0x8b   : > { %s886_s29 = scalar_lea.vmem %s3222_s13, %s2844_s14  ;;  %s1987_s26 = sshll.u32 %s2844_s14, 5 }
  0x8c   : > { %s894_s9 = scalar_lea.vmem %s3223_s23, %s2844_s14  ;;  %s3224_s30 = sld [smem:[#allocation47_spill]] }
  0x8d   : > { %s897_s3 = scalar_lea.vmem %s3225_s19, %s2844_s14  ;;  %s2883_s18 = scalar_lea.vmem [#allocation16], %s3226_s10 }
  0x8e   : > { %902 = sbr.rel (%p1925_p6) target bundleno = 153 (0x99), region = 150 }
  0x92   : > { %s2875_s25 = scalar_lea.vmem %s3224_s30, %s1987_s26 }
  0x93   : > { %v903_v2 = vld [vmem:[%s2811_s24] sm:$0xff]  ;;  %vm908_vm0 = vcmask 261120   ;;  %v904_v4 = vld [vmem:[%s2811_s24 + $0x8] sm:$0xff] }
  0x94   : > { %v905_v3 = vld [vmem:[%s2814_s6] sm:$0xff] }
  0x95   : > { %v906_v5 = vadd.f32 %v905_v3, %v903_v2  ;;  %v907_v6 = vadd.f32 %v905_v3, %v904_v4 }
  0x97   : > { %909 = vst.msk [vmem:[#allocation2] sm:$0xff] %vm908_vm0, %v906_v5 }
  0x98   : > { %910 = vst.msk [vmem:[#allocation2 + $0x8] sm:$0xff] %vm908_vm0, %v907_v6 }
  0x99 PF: > { %v1989_v7 = vld [vmem:[%s872_s5 + $0x8] sm:$0xff]  ;;  %v1988_v8 = vld [vmem:[%s872_s5] sm:$0xff]  ;;  %vm934_vm1 = vcmask 261120   ;;  %s3227_s1 = scalar_lea.vmem [#allocation8], %s2822_s11  ;;  %s2507_s7 = smov 96   ;;  %vm959_vm2 = vcmask 64512  }
  0x9a   : > { %944 = vmatpush.bf16.msra.mxu0 %v1989_v7  ;;  %v2129_v12 = vld [vmem:[%s3227_s1] ss:$0 sm:$0xff]  ;;  %s2508_s13 = smov 120   ;;  %s2509_s26 = smov 112  }
  0x9b   : > { %s2510_s24 = smov 104   ;;  %s2511_s6 = smov 64  }
  0x9c   : > { %s3228_s5 = sld [smem:[#allocation42_spill]]  ;;  %s3231_s23 = scalar_lea.vmem [#allocation10], %s2822_s11 }
  0x9d   : > { %s3235_s19 = scalar_lea.vmem [#allocation13], %s2822_s11 }
  0x9e   : > { %v2889_v9 = vld [vmem:[#allocation2] sm:$0xff]  ;;  %945 = vmatpush.bf16.msra.mxu0 %v1988_v8 }
  0x9f   : > { %v2891_v10 = vld [vmem:[#allocation2 + $0x8] sm:$0xff] }
  0xa0   : > { %v913_v11 = vpack.c.bf16 %v2891_v10, %v2889_v9 }
  0xa2   : > { %1934 = vmatmul.msk.bf16.vlgmr.msra.gmra.mxu0 %vm934_vm1, %v913_v11 }
 0x11f   : > { %v947_v13 = vpop.f32.mrf.mxu0 }
 0x120   : > { %v2898_v14 = vadd.f32 %v2129_v12, %v947_v13 }
 0x122   : > { %955 = vrot.lane.b32.xlu0 %v2898_v14, %s2507_s7  ;;  %v952_v18 = vmul.f32 0.35355338, %v2898_v14 }
 0x127   : > { %v949_v15 = vpop.f32.mrf.mxu0 }
 0x128   : > { %v2901_v16 = vadd.f32 %v2129_v12, %v949_v15 }
 0x12a   : > { %964 = vrot.lane.b32.xlu0 %v2901_v16, %s2507_s7  ;;  %v953_v17 = vmul.f32 0.35355338, %v2901_v16 }
 0x194   : > { %v956_v19 = vpop.permute.xlu0 %955 }
 0x195   : > { %v958_v20 = vmul.f32 %v956_v19, %v952_v18  ;;  %v1140_v21 = vmul.f32 %v956_v19, %v953_v17 }
 0x197   : > { %1182 = vrot.lane.b32.xlu2 %v1140_v21, %s2508_s13  ;;  %1050 = vrot.lane.b32.xlu0 %v958_v20, %s2509_s26  ;;  %v960_v24 = vsel %vm959_vm2, %v958_v20, 0.0  ;;  %v1141_v25 = vsel %vm959_vm2, %v1140_v21, 0.0 }
 0x198   : > { %1004 = vrot.lane.b32.xlu1 %v958_v20, %s2508_s13 }
 0x19c   : > { %v965_v22 = vpop.permute.xlu0 %964 }
 0x19d   : > { %v1144_v23 = vmul.f32 %v965_v22, %v953_v17  ;;  %v967_v26 = vmul.f32 %v965_v22, %v952_v18 }
 0x19f   : > { %1227 = vrot.lane.b32.xlu2 %v1140_v21, %s2509_s26  ;;  %1271 = vrot.lane.b32.xlu0 %v1140_v21, %s2510_s24  ;;  %v968_v27 = vsel %vm959_vm2, %v967_v26, 0.0  ;;  %v1145_v30 = vsel %vm959_vm2, %v1144_v23, 0.0 }
 0x1a0   : > { %1095 = vrot.lane.b32.xlu1 %v958_v20, %s2510_s24 }
 0x1a7   : > { %1233 = vrot.lane.b32.xlu0 %v1144_v23, %s2509_s26 }
 0x1c8   : > { %961 = vadd.xlane.f32.xlu2 %v960_v24 }
 0x1ca   : > { %1142 = vadd.xlane.f32.xlu1 %v1141_v25 }
 0x1d1   : > { %969 = vadd.xlane.f32.xlu0 %v968_v27 }
 0x1e0   : > { %1189 = vrot.lane.b32.xlu2 %v1144_v23, %s2508_s13 }
 0x1e3   : > { %1011 = vrot.lane.b32.xlu1 %v967_v26, %s2508_s13 }
 0x1e8   : > { %1101 = vrot.lane.b32.xlu2 %v967_v26, %s2510_s24 }
 0x1eb   : > { %1056 = vrot.lane.b32.xlu1 %v967_v26, %s2509_s26 }
 0x1f1   : > { %v1183_v31 = vpop.permute.xlu2 %1182 }
 0x1f2   : > { %v1185_v34 = vsel %vm959_vm2, %v1183_v31, 0.0 }
 0x1f3   : > { %1277 = vrot.lane.b32.xlu1 %v1144_v23, %s2510_s24 }
 0x1f9   : > { %v1228_v35 = vpop.permute.xlu2 %1227 }
 0x1fa   : > { %v1230_v36 = vsel %vm959_vm2, %v1228_v35, 0.0 }
 0x209   : > { %v1051_v28 = vpop.permute.xlu0 %1050 }
 0x20a   : > { %v1053_v29 = vsel %vm959_vm2, %v1051_v28, 0.0  ;;  %v1005_v32 = vpop.permute.xlu1 %1004 }
 0x20b   : > { %1054 = vadd.xlane.f32.xlu0 %v1053_v29  ;;  %v1007_v33 = vsel %vm959_vm2, %v1005_v32, 0.0 }
 0x211   : > { %1146 = vadd.xlane.f32.xlu2 %v1145_v30  ;;  %v1272_v39 = vpop.permute.xlu0 %1271 }
 0x212   : > { %v1096_v37 = vpop.permute.xlu1 %1095  ;;  %v1274_v8 = vsel %vm959_vm2, %v1272_v39, 0.0 }
 0x213   : > { %v1098_v38 = vsel %vm959_vm2, %v1096_v37, 0.0 }
 0x219   : > { %1008 = vadd.xlane.f32.xlu2 %v1007_v33  ;;  %v1234_v41 = vpop.permute.xlu0 %1233 }
 0x21a   : > { %v1236_v61 = vsel %vm959_vm2, %v1234_v41, 0.0 }
 0x21d   : > { %1186 = vadd.xlane.f32.xlu1 %v1185_v34 }
 0x221   : > { %1231 = vadd.xlane.f32.xlu2 %v1230_v36 }
 0x225   : > { %1099 = vadd.xlane.f32.xlu1 %v1098_v38 }
 0x23b   : > { %v962_v40 = vpop.xlane.xlu2 %961 }
 0x23d   : > { %v1143_v52 = vpop.xlane.xlu1 %1142 }
 0x243   : > { %v1190_v42 = vpop.permute.xlu2 %1189 }
 0x244   : > { %v970_v43 = vpop.xlane.xlu0 %969  ;;  %v1192_v44 = vsel %vm959_vm2, %v1190_v42, 0.0 }
 0x245   : > { %v971_v45 = vmax.f32 %v962_v40, %v970_v43  ;;  %1193 = vadd.xlane.f32.xlu2 %v1192_v44 }
 0x247   : > { %v972_v46 = vsub.f32 %v962_v40, %v971_v45  ;;  %v975_v47 = vsub.f32 %v970_v43, %v971_v45 }
 0x249   : > { %v973_v48 = vmul.f32 1.442695, %v972_v46  ;;  %v976_v49 = vmul.f32 1.442695, %v975_v47 }
 0x24b   : > { %2137 = vpow2.f32 %v973_v48  ;;  %v1102_v50 = vpop.permute.xlu2 %1101 }
 0x24c   : > { %2139 = vpow2.f32 %v976_v49  ;;  %v1104_v51 = vsel %vm959_vm2, %v1102_v50, 0.0 }
 0x24d   : > { %1105 = vadd.xlane.f32.xlu2 %v1104_v51 }
 0x251   : > { %v2138_v53 = vpop.eup %2137 }
 0x252   : > { %v2140_v54 = vpop.eup %2139 }
 0x253   : > { %v978_v55 = vadd.f32 %v2140_v54, %v2138_v53 }
 0x255   : > { %2141 = vrcp.f32 %v978_v55  ;;  %v1012_v56 = vpop.permute.xlu1 %1011  ;;  %v990_v0 = vand.u32 2147483648, %v978_v55  ;;  %v988_v2 = vand.u32 2147483647, %v978_v55  ;;  %vm984_vm4 = vweird.f32 %v978_v55 }
 0x256   : > { %v1014_v57 = vsel %vm959_vm2, %v1012_v56, 0.0 }
 0x257   : > { %1015 = vadd.xlane.f32.xlu0 %v1014_v57  ;;  %v991_v4 = vor.u32 1.1754944e-38, %v990_v0  ;;  %vm989_vm6 = vcmp.eq.f32.partialorder %v988_v2, 8.507059e+37 }
 0x25b   : > { %v2142_v58 = vpop.eup %2141 }
 0x25c   : > { %v980_v59 = vmul.f32 %v2142_v58, %v978_v55  ;;  %vm985_vm3 = vweird.f32 %v2142_v58 }
 0x25d   : > { %v1057_v60 = vpop.permute.xlu1 %1056  ;;  %vm986_vm5 = vmor %vm984_vm4, %vm985_vm3 }
 0x25e   : > { %v1059_v62 = vsel %vm959_vm2, %v1057_v60, 0.0  ;;  %v981_v63 = vsub.f32 1.0, %v980_v59 }
 0x25f   : > { %1237 = vadd.xlane.f32.xlu0 %v1236_v61  ;;  %1060 = vadd.xlane.f32.xlu1 %v1059_v62 }
 0x260   : > { %v982_v1 = vmul.f32 %v2142_v58, %v981_v63 }
 0x262   : > { %v983_v3 = vadd.f32 %v2142_v58, %v982_v1 }
 0x264   : > { %v987_v5 = vsel %vm986_vm5, %v2142_v58, %v983_v3 }
 0x265   : > { %v1278_v6 = vpop.permute.xlu1 %1277  ;;  %v992_v7 = vsel %vm989_vm6, %v991_v4, %v987_v5 }
 0x266   : > { %v1280_v11 = vsel %vm959_vm2, %v1278_v6, 0.0  ;;  %v993_v12 = vmul.f32 %v2138_v53, %v992_v7  ;;  %v995_v13 = vmul.f32 %v2140_v54, %v992_v7 }
 0x267   : > { %1275 = vadd.xlane.f32.xlu0 %v1274_v8  ;;  %1281 = vadd.xlane.f32.xlu1 %v1280_v11 }
 0x268   : > { %v994_v15 = vmul.f32 %v993_v12, %v2898_v14  ;;  %v996_v17 = vmul.f32 %v995_v13, %v2901_v16 }
 0x26a   : > { %v997_v18 = vadd.f32 %v996_v17, %v994_v15 }
 0x26c   : > { %999 = vrot.lane.b32.xlu2 %v997_v18, %s2511_s6 }
 0x27e   : > { %v1055_v55 = vpop.xlane.xlu0 %1054 }
 0x284   : > { %v1147_v19 = vpop.xlane.xlu2 %1146 }
 0x285   : > { %v1148_v20 = vmax.f32 %v1143_v52, %v1147_v19 }
 0x287   : > { %v1149_v21 = vsub.f32 %v1143_v52, %v1148_v20  ;;  %v1152_v22 = vsub.f32 %v1147_v19, %v1148_v20 }
 0x289   : > { %v1150_v23 = vmul.f32 1.442695, %v1149_v21  ;;  %v1153_v24 = vmul.f32 1.442695, %v1152_v22 }
 0x28b   : > { %2143 = vpow2.f32 %v1150_v23 }
 0x28c   : > { %2145 = vpow2.f32 %v1153_v24  ;;  %v1009_v38 = vpop.xlane.xlu2 %1008 }
 0x290   : > { %v1187_v45 = vpop.xlane.xlu1 %1186 }
 0x291   : > { %v2144_v25 = vpop.eup %2143 }
 0x292   : > { %v2146_v26 = vpop.eup %2145 }
 0x293   : > { %v1155_v27 = vadd.f32 %v2146_v26, %v2144_v25 }
 0x294   : > { %v1232_v44 = vpop.xlane.xlu2 %1231 }
 0x295   : > { %2147 = vrcp.f32 %v1155_v27  ;;  %v1167_v31 = vand.u32 2147483648, %v1155_v27  ;;  %v1165_v33 = vand.u32 2147483647, %v1155_v27  ;;  %vm1161_vm8 = vweird.f32 %v1155_v27 }
 0x297   : > { %v1168_v35 = vor.u32 1.1754944e-38, %v1167_v31  ;;  %vm1166_vm10 = vcmp.eq.f32.partialorder %v1165_v33, 8.507059e+37 }
 0x298   : > { %v1100_v52 = vpop.xlane.xlu1 %1099 }
 0x29b   : > { %v2148_v28 = vpop.eup %2147 }
 0x29c   : > { %v1157_v29 = vmul.f32 %v2148_v28, %v1155_v27  ;;  %vm1162_vm7 = vweird.f32 %v2148_v28 }
 0x29d   : > { %vm1163_vm9 = vmor %vm1161_vm8, %vm1162_vm7 }
 0x29e   : > { %v1158_v30 = vsub.f32 1.0, %v1157_v29 }
 0x2a0   : > { %v1159_v32 = vmul.f32 %v2148_v28, %v1158_v30 }
 0x2a2   : > { %v1160_v34 = vadd.f32 %v2148_v28, %v1159_v32 }
 0x2a4   : > { %v1164_v36 = vsel %vm1163_vm9, %v2148_v28, %v1160_v34 }
 0x2a5   : > { %v1169_v37 = vsel %vm1166_vm10, %v1168_v35, %v1164_v36 }
 0x2a6   : > { %v1170_v39 = vmul.f32 %v2144_v25, %v1169_v37  ;;  %v1172_v40 = vmul.f32 %v2146_v26, %v1169_v37 }
 0x2a8   : > { %v1171_v41 = vmul.f32 %v1170_v39, %v2898_v14  ;;  %v1173_v42 = vmul.f32 %v1172_v40, %v2901_v16 }
 0x2aa   : > { %v1174_v43 = vadd.f32 %v1173_v42, %v1171_v41 }
 0x2ac   : > { %1176 = vrot.lane.b32.xlu0 %v1174_v43, %s2511_s6 }
 0x2b8   : > { %v1194_v46 = vpop.xlane.xlu2 %1193 }
 0x2b9   : > { %v1195_v47 = vmax.f32 %v1187_v45, %v1194_v46 }
 0x2bb   : > { %v1196_v48 = vsub.f32 %v1187_v45, %v1195_v47  ;;  %v1199_v49 = vsub.f32 %v1194_v46, %v1195_v47 }
 0x2bd   : > { %v1197_v50 = vmul.f32 1.442695, %v1196_v48  ;;  %v1200_v51 = vmul.f32 1.442695, %v1199_v49 }
 0x2bf   : > { %2149 = vpow2.f32 %v1197_v50 }
 0x2c0   : > { %2151 = vpow2.f32 %v1200_v51  ;;  %v1106_v53 = vpop.xlane.xlu2 %1105 }
 0x2c1   : > { %v1107_v54 = vmax.f32 %v1100_v52, %v1106_v53 }
 0x2c3   : > { %v1108_v56 = vsub.f32 %v1100_v52, %v1107_v54  ;;  %v1111_v57 = vsub.f32 %v1106_v53, %v1107_v54 }
 0x2c5   : > { %v2150_v58 = vpop.eup %2149  ;;  %v1109_v59 = vmul.f32 1.442695, %v1108_v56  ;;  %v1112_v60 = vmul.f32 1.442695, %v1111_v57 }
 0x2c6   : > { %v2152_v61 = vpop.eup %2151 }
 0x2c7   : > { %v1202_v62 = vadd.f32 %v2152_v61, %v2150_v58  ;;  %2153 = vpow2.f32 %v1109_v59 }
 0x2c8   : > { %2155 = vpow2.f32 %v1112_v60  ;;  %v1000_v63 = vpop.permute.xlu2 %999 }
 0x2c9   : > { %2157 = vrcp.f32 %v1202_v62  ;;  %1002 = vst.msk [vmem:[#allocation3] sm:$0xff] %vm959_vm2, %v1000_v63  ;;  %v1214_v18 = vand.u32 2147483648, %v1202_v62  ;;  %v1212_v22 = vand.u32 2147483647, %v1202_v62  ;;  %vm1208_vm12 = vweird.f32 %v1202_v62 }
 0x2ca   : > { %v1016_v0 = vpop.xlane.xlu0 %1015 }
 0x2cb   : > { %v1017_v1 = vmax.f32 %v1009_v38, %v1016_v0  ;;  %v1215_v28 = vor.u32 1.1754944e-38, %v1214_v18  ;;  %vm1213_vm14 = vcmp.eq.f32.partialorder %v1212_v22, 8.507059e+37 }
 0x2cd   : > { %v2929_v2 = vpop.eup %2153  ;;  %v1018_v3 = vsub.f32 %v1009_v38, %v1017_v1  ;;  %v1021_v4 = vsub.f32 %v1016_v0, %v1017_v1 }
 0x2ce   : > { %v2931_v5 = vpop.eup %2155 }
 0x2cf   : > { %v2158_v6 = vpop.eup %2157  ;;  %v2935_v7 = vadd.f32 %v2931_v5, %v2929_v2  ;;  %v1019_v8 = vmul.f32 1.442695, %v1018_v3  ;;  %v1022_v11 = vmul.f32 1.442695, %v1021_v4 }
 0x2d0   : > { %v1204_v12 = vmul.f32 %v2158_v6, %v1202_v62  ;;  %vm1209_vm11 = vweird.f32 %v2158_v6 }
 0x2d1   : > { %2159 = vrcp.f32 %v2935_v7  ;;  %vm1210_vm13 = vmor %vm1208_vm12, %vm1209_vm11  ;;  %v1124_v39 = vand.u32 2147483647, %v2935_v7  ;;  %v1126_v47 = vand.u32 2147483648, %v2935_v7  ;;  %vm1120_vm0 = vweird.f32 %v2935_v7 }
 0x2d2   : > { %2161 = vpow2.f32 %v1019_v8  ;;  %v1238_v13 = vpop.xlane.xlu0 %1237  ;;  %v1061_v15 = vpop.xlane.xlu1 %1060  ;;  %v1205_v17 = vsub.f32 1.0, %v1204_v12 }
 0x2d3   : > { %2163 = vpow2.f32 %v1022_v11  ;;  %v1239_v19 = vmax.f32 %v1232_v44, %v1238_v13  ;;  %v1062_v20 = vmax.f32 %v1055_v55, %v1061_v15  ;;  %v1127_v59 = vor.u32 1.1754944e-38, %v1126_v47 }
 0x2d4   : > { %v1206_v21 = vmul.f32 %v2158_v6, %v1205_v17  ;;  %vm1125_vm4 = vcmp.eq.f32.partialorder %v1124_v39, 8.507059e+37 }
 0x2d5   : > { %v1240_v23 = vsub.f32 %v1232_v44, %v1239_v19  ;;  %v1243_v24 = vsub.f32 %v1238_v13, %v1239_v19  ;;  %v1063_v25 = vsub.f32 %v1055_v55, %v1062_v20  ;;  %v1066_v26 = vsub.f32 %v1061_v15, %v1062_v20 }
 0x2d6   : > { %v1207_v27 = vadd.f32 %v2158_v6, %v1206_v21 }
 0x2d7   : > { %v2160_v29 = vpop.eup %2159  ;;  %v1241_v30 = vmul.f32 1.442695, %v1240_v23  ;;  %v1244_v31 = vmul.f32 1.442695, %v1243_v24  ;;  %v1064_v32 = vmul.f32 1.442695, %v1063_v25 }
 0x2d8   : > { %v2938_v33 = vpop.eup %2161  ;;  %v1211_v34 = vsel %vm1210_vm13, %v2158_v6, %v1207_v27  ;;  %v1116_v35 = vmul.f32 %v2160_v29, %v2935_v7  ;;  %v1067_v37 = vmul.f32 1.442695, %v1066_v26  ;;  %vm1121_vm15 = vweird.f32 %v2160_v29 }
 0x2d9   : > { %v2941_v36 = vpop.eup %2163  ;;  %2165 = vpow2.f32 %v1241_v30  ;;  %v1216_v38 = vsel %vm1213_vm14, %v1215_v28, %v1211_v34  ;;  %vm1122_vm3 = vmor %vm1120_vm0, %vm1121_vm15 }
 0x2da   : > { %v2946_v40 = vadd.f32 %v2941_v36, %v2938_v33  ;;  %2167 = vpow2.f32 %v1244_v31  ;;  %v1276_v41 = vpop.xlane.xlu0 %1275  ;;  %v1282_v42 = vpop.xlane.xlu1 %1281  ;;  %v1217_v43 = vmul.f32 %v2150_v58, %v1216_v38  ;;  %v1219_v44 = vmul.f32 %v2152_v61, %v1216_v38 }
 0x2db   : > { %2169 = vpow2.f32 %v1064_v32  ;;  %v1283_v45 = vmax.f32 %v1276_v41, %v1282_v42  ;;  %v1117_v46 = vsub.f32 1.0, %v1116_v35 }
 0x2dc   : > { %2171 = vrcp.f32 %v2946_v40  ;;  %v1218_v48 = vmul.f32 %v1217_v43, %v2898_v14  ;;  %v1220_v49 = vmul.f32 %v1219_v44, %v2901_v16  ;;  %v1036_v13 = vand.u32 2147483648, %v2946_v40 }
 0x2dd   : > { %2173 = vpow2.f32 %v1067_v37  ;;  %v1284_v50 = vsub.f32 %v1276_v41, %v1283_v45  ;;  %v1287_v51 = vsub.f32 %v1282_v42, %v1283_v45  ;;  %v1118_v52 = vmul.f32 %v2160_v29, %v1117_v46 }
 0x2de   : > { %v1221_v53 = vadd.f32 %v1220_v49, %v1218_v48  ;;  %vm1030_vm6 = vweird.f32 %v2946_v40  ;;  %v1037_v22 = vor.u32 1.1754944e-38, %v1036_v13 }
 0x2df   : > { %v2952_v54 = vpop.eup %2165  ;;  %v1285_v55 = vmul.f32 1.442695, %v1284_v50  ;;  %v1288_v56 = vmul.f32 1.442695, %v1287_v51  ;;  %v1119_v57 = vadd.f32 %v2160_v29, %v1118_v52 }
 0x2e0   : > { %v2955_v58 = vpop.eup %2167  ;;  %1223 = vrot.lane.b32.xlu0 %v1221_v53, %s2511_s6 }
 0x2e1   : > { %v2958_v60 = vpop.eup %2169  ;;  %v1246_v61 = vadd.f32 %v2955_v58, %v2952_v54  ;;  %2175 = vpow2.f32 %v1285_v55  ;;  %v1123_v62 = vsel %vm1122_vm3, %v2160_v29, %v1119_v57 }
 0x2e2   : > { %v2172_v63 = vpop.eup %2171  ;;  %2177 = vpow2.f32 %v1288_v56  ;;  %v1128_v0 = vsel %vm1125_vm4, %v1127_v59, %v1123_v62 }
 0x2e3   : > { %v2962_v1 = vpop.eup %2173  ;;  %2179 = vrcp.f32 %v1246_v61  ;;  %v1129_v3 = vmul.f32 %v2929_v2, %v1128_v0  ;;  %v1131_v4 = vmul.f32 %v2931_v5, %v1128_v0  ;;  %v1026_v6 = vmul.f32 %v2172_v63, %v2946_v40 }
 0x2e4   : > { %v1069_v7 = vadd.f32 %v2962_v1, %v2958_v60  ;;  %vm1031_vm5 = vweird.f32 %v2172_v63  ;;  %v1034_v2 = vand.u32 2147483647, %v2946_v40  ;;  %v1258_v31 = vand.u32 2147483648, %v1246_v61 }
 0x2e5   : > { %v1130_v8 = vmul.f32 %v1129_v3, %v2898_v14  ;;  %v1132_v11 = vmul.f32 %v1131_v4, %v2901_v16  ;;  %v1027_v12 = vsub.f32 1.0, %v1026_v6  ;;  %vm1032_vm7 = vmor %vm1030_vm6, %vm1031_vm5  ;;  %v1256_v34 = vand.u32 2147483647, %v1246_v61 }
 0x2e6   : > { %2181 = vrcp.f32 %v1069_v7  ;;  %vm1035_vm8 = vcmp.eq.f32.partialorder %v1034_v2, 8.507059e+37  ;;  %v1079_v39 = vand.u32 2147483647, %v1069_v7  ;;  %v1081_v40 = vand.u32 2147483648, %v1069_v7  ;;  %v1990_v2 = vld [vmem:[%s2857_s27] sm:$0xff] }
 0x2e7   : > { %v2972_v15 = vpop.eup %2175  ;;  %v1133_v17 = vadd.f32 %v1132_v11, %v1130_v8  ;;  %v1028_v18 = vmul.f32 %v2172_v63, %v1027_v12  ;;  %vm1252_vm10 = vweird.f32 %v1246_v61  ;;  %vm1257_vm13 = vcmp.eq.f32.partialorder %v1256_v34, 8.507059e+37 }
 0x2e8   : > { %v2975_v5 = vpop.eup %2177  ;;  %vm1075_vm14 = vweird.f32 %v1069_v7  ;;  %vm1080_vm15 = vcmp.eq.f32.partialorder %v1079_v39, 8.507059e+37  ;;  %v1082_v48 = vor.u32 1.1754944e-38, %v1081_v40  ;;  %v2512_v34 = vmov 32.0  }
 0x2e9   : > { %v2180_v19 = vpop.eup %2179  ;;  %v2979_v20 = vadd.f32 %v2975_v5, %v2972_v15  ;;  %1135 = vrot.lane.b32.xlu0 %v1133_v17, %s2511_s6  ;;  %v1029_v21 = vadd.f32 %v2172_v63, %v1028_v18  ;;  %v1991_v18 = vld [vmem:[%s2857_s27 + $0x8] sm:$0xff]  ;;  %s3229_s27 = scalar_lea.vmem %s3228_s5, %s2844_s14  ;;  %s3236_s14 = sld [smem:[#allocation26_spill]] }
 0x2ea   : > { %v1248_v23 = vmul.f32 %v2180_v19, %v1246_v61  ;;  %vm1253_vm9 = vweird.f32 %v2180_v19  ;;  %1347 = vmatpush.bf16.msra.mxu1 %v1991_v18 }
 0x2eb   : > { %2183 = vrcp.f32 %v2979_v20  ;;  %v1033_v24 = vsel %vm1032_vm7, %v2172_v63, %v1029_v21  ;;  %vm1254_vm12 = vmor %vm1252_vm10, %vm1253_vm9  ;;  %v1300_v53 = vand.u32 2147483647, %v2979_v20  ;;  %v1302_v55 = vand.u32 2147483648, %v2979_v20 }
 0x2ec   : > { %v2182_v25 = vpop.eup %2181  ;;  %v1038_v26 = vsel %vm1035_vm8, %v1037_v22, %v1033_v24  ;;  %v1249_v27 = vsub.f32 1.0, %v1248_v23  ;;  %vm1296_vm4 = vweird.f32 %v2979_v20  ;;  %vm1048_vm7 = vcmask 130112   ;;  %v2130_v24 = vld [vmem:[%s3229_s27] ss:$0 sm:$0xff] }
 0x2ed   : > { %v1039_v28 = vmul.f32 %v2938_v33, %v1038_v26  ;;  %v1041_v29 = vmul.f32 %v2941_v36, %v1038_v26  ;;  %v1071_v30 = vmul.f32 %v2182_v25, %v1069_v7  ;;  %vm1076_vm11 = vweird.f32 %v2182_v25 }
 0x2ee   : > { %v1250_v32 = vmul.f32 %v2180_v19, %v1249_v27  ;;  %v1259_v33 = vor.u32 1.1754944e-38, %v1258_v31  ;;  %vm1077_vm0 = vmor %vm1075_vm14, %vm1076_vm11  ;;  %v1303_v4 = vor.u32 1.1754944e-38, %v1302_v55  ;;  %vm1301_vm6 = vcmp.eq.f32.partialorder %v1300_v53, 8.507059e+37  ;;  %1348 = vmatpush.bf16.msra.mxu1 %v1990_v2 }
 0x2ef   : > { %v1040_v35 = vmul.f32 %v1039_v28, %v2898_v14  ;;  %v1042_v37 = vmul.f32 %v1041_v29, %v2901_v16  ;;  %v1072_v38 = vsub.f32 1.0, %v1071_v30  ;;  %vm1093_vm8 = vcmask 195712   ;;  %p1970_p13 = scmp.ne.s32.totalorder %s3236_s14, 1 }
 0x2f0   : > { %v1251_v41 = vadd.f32 %v2180_v19, %v1250_v32  ;;  %vm1138_vm9 = vcmask 261312   ;;  %2185 = vrcp.f32 %v2512_v34  ;;  %s3237_s10 = sld [smem:[#allocation52_spill]] (!%p1970_p13) }
 0x2f1   : > { %v2184_v42 = vpop.eup %2183  ;;  %v1043_v43 = vadd.f32 %v1042_v37, %v1040_v35  ;;  %v1073_v44 = vmul.f32 %v2182_v25, %v1072_v38 }
 0x2f2   : > { %v1255_v36 = vsel %vm1254_vm12, %v2180_v19, %v1251_v41  ;;  %v1292_v45 = vmul.f32 %v2184_v42, %v2979_v20  ;;  %vm1297_vm3 = vweird.f32 %v2184_v42 }
 0x2f3   : > { %1045 = vrot.lane.b32.xlu1 %v1043_v43, %s2511_s6  ;;  %v1074_v46 = vadd.f32 %v2182_v25, %v1073_v44  ;;  %v1260_v47 = vsel %vm1257_vm13, %v1259_v33, %v1255_v36  ;;  %vm1298_vm5 = vmor %vm1296_vm4, %vm1297_vm3 }
 0x2f4   : > { %v1261_v49 = vmul.f32 %v2952_v54, %v1260_v47  ;;  %v1263_v50 = vmul.f32 %v2955_v58, %v1260_v47  ;;  %v1293_v51 = vsub.f32 1.0, %v1292_v45 }
 0x2f5   : > { %v1078_v52 = vsel %vm1077_vm0, %v2182_v25, %v1074_v46  ;;  %vm1497_vm0 = vcmask 523264  }
 0x2f6   : > { %v1083_v56 = vsel %vm1080_vm15, %v1082_v48, %v1078_v52  ;;  %v1262_v57 = vmul.f32 %v1261_v49, %v2898_v14  ;;  %v1264_v59 = vmul.f32 %v1263_v50, %v2901_v16  ;;  %v1294_v61 = vmul.f32 %v2184_v42, %v1293_v51  ;;  %v2186_v35 = vpop.eup %2185  ;;  %v1993_v48 = vld [vmem:[%s2831_s0 + $0x8] sm:$0xff]  ;;  %v1992_v51 = vld [vmem:[%s2831_s0] sm:$0xff] }
 0x2f7   : > { %v1084_v62 = vmul.f32 %v2958_v60, %v1083_v56  ;;  %v1086_v63 = vmul.f32 %v2962_v1, %v1083_v56  ;;  %v1366_v37 = vmul.f32 32.0, %v2186_v35  ;;  %1450 = vmatpush.bf16.msra.mxu2 %v1993_v48 }
 0x2f8   : > { %v1265_v54 = vadd.f32 %v1264_v59, %v1262_v57  ;;  %v1295_v0 = vadd.f32 %v2184_v42, %v1294_v61 }
 0x2f9   : > { %v1085_v58 = vmul.f32 %v1084_v62, %v2898_v14  ;;  %v1087_v3 = vmul.f32 %v1086_v63, %v2901_v16  ;;  %v1367_v38 = vsub.f32 1.0, %v1366_v37 }
 0x2fa   : > { %v1299_v6 = vsel %vm1298_vm5, %v2184_v42, %v1295_v0 }
 0x2fb   : > { %v1088_v7 = vadd.f32 %v1087_v3, %v1085_v58  ;;  %1267 = vrot.lane.b32.xlu1 %v1265_v54, %s2511_s6  ;;  %v1304_v60 = vsel %vm1301_vm6, %v1303_v4, %v1299_v6  ;;  %v1368_v39 = vmul.f32 %v2186_v35, %v1367_v38  ;;  %1451 = vmatpush.bf16.msra.mxu2 %v1992_v51 }
 0x2fc   : > { %v1305_v1 = vmul.f32 %v2972_v15, %v1304_v60  ;;  %v1307_v8 = vmul.f32 %v2975_v5, %v1304_v60 }
 0x2fd   : > { %1090 = vrot.lane.b32.xlu2 %v1088_v7, %s2511_s6  ;;  %v1369_v40 = vadd.f32 %v2186_v35, %v1368_v39 }
 0x2fe   : > { %v1306_v11 = vmul.f32 %v1305_v1, %v2898_v14  ;;  %v1308_v12 = vmul.f32 %v1307_v8, %v2901_v16  ;;  %v2131_v1 = vld [vmem:[%s883_s28] ss:$0 sm:$0xff] }
 0x300   : > { %v1309_v13 = vadd.f32 %v1308_v12, %v1306_v11 }
 0x305   : > { %1311 = vrot.lane.b32.xlu2 %v1309_v13, %s2511_s6 }
 0x31e   : > { %v1177_v17 = vpop.permute.xlu0 %1176 }
 0x31f   : > { %1180 = vst.msk [vmem:[#allocation3 + $0x8] sm:$0xff] %vm959_vm2, %v1177_v17  ;;  %vm1370_vm2 = vweird.f32 %v2186_v35  ;;  %v2132_v17 = vld [vmem:[%s3231_s23] ss:$0 sm:$0xff] }
 0x352   : > { %v1224_v19 = vpop.permute.xlu0 %1223 }
 0x353   : > { %1226 = vst.msk [vmem:[#allocation3 + $0x8] sm:$0xff] %vm1048_vm7, %v1224_v19 }
 0x357   : > { %v1091_v15 = vpop.permute.xlu2 %1090 }
 0x35b   : > { %v1136_v16 = vpop.permute.xlu0 %1135 }
 0x35f   : > { %v1312_v20 = vpop.permute.xlu2 %1311 }
 0x365   : > { %v1046_v14 = vpop.permute.xlu1 %1045 }
 0x366   : > { %1049 = vst.msk [vmem:[#allocation3] sm:$0xff] %vm1048_vm7, %v1046_v14  ;;  %v1997_v14 = vld [vmem:[%s2875_s25 + $0x18] sm:$0xff] }
 0x367   : > { %1094 = vst.msk [vmem:[#allocation3] sm:$0xff] %vm1093_vm8, %v1091_v15  ;;  %1505 = vmatpush.bf16.msra.mxu3 %v1997_v14 }
 0x368   : > { %1139 = vst.msk [vmem:[#allocation3] sm:$0xff] %vm1138_vm9, %v1136_v16  ;;  %v1996_v16 = vld [vmem:[%s2875_s25 + $0x10] sm:$0xff] }
 0x36b   : > { %1506 = vmatpush.bf16.msra.mxu3 %v1996_v16 }
 0x36d   : > { %v1268_v5 = vpop.permute.xlu1 %1267 }
 0x36e   : > { %1270 = vst.msk [vmem:[#allocation3 + $0x8] sm:$0xff] %vm1093_vm8, %v1268_v5  ;;  %v1995_v5 = vld [vmem:[%s2875_s25 + $0x8] sm:$0xff] }
 0x36f   : > { %1314 = vst.msk [vmem:[#allocation3 + $0x8] sm:$0xff] %vm1138_vm9, %v1312_v20  ;;  %v1315_v21 = vld [vmem:[#allocation3] sm:$0xff]  ;;  %1507 = vmatpush.bf16.msra.mxu3 %v1995_v5  ;;  %v1994_v20 = vld [vmem:[%s2875_s25] sm:$0xff] }
 0x373   : > { %1508 = vmatpush.bf16.msra.mxu3 %v1994_v20 }
 0x376   : > { %v1316_v22 = vld [vmem:[#allocation3 + $0x8] sm:$0xff] }
 0x377   : > { %v1317_v23 = vpack.c.bf16 %v1316_v22, %v1315_v21  ;;  %v2133_v22 = vld [vmem:[%s886_s29] ss:$0 sm:$0xff] }
 0x379   : > { %1943 = vmatmul.msk.bf16.vlgmr.msra.gmra.mxu1 %vm934_vm1, %v1317_v23 }
 0x3f6   : > { %v1350_v25 = vpop.f32.mrf.mxu1 }
 0x3f7   : > { %v1351_v26 = vadd.f32 %v2130_v24, %v1350_v25 }
 0x3f9   : > { %v1355_v27 = vadd.f32 %v1351_v26, %v2889_v9  ;;  %v3021_v9 = vsel %vm1370_vm2, %v2186_v35, %v1369_v40 }
 0x3fb   : > { %v1359_v28 = vsel %vm934_vm1, %v1355_v27, 0.0 }
 0x3fc   : > { %1360 = vadd.xlane.f32.xlu1 %v1359_v28 }
 0x3fe   : > { %v1352_v29 = vpop.f32.mrf.mxu1 }
 0x3ff   : > { %v1353_v30 = vadd.f32 %v2130_v24, %v1352_v29  ;;  %v2134_v29 = vld [vmem:[%s894_s9] ss:$0 sm:$0xff] }
 0x401   : > { %v1356_v31 = vadd.f32 %v1353_v30, %v2891_v10 }
 0x403   : > { %v1362_v32 = vsel %vm934_vm1, %v1356_v31, 0.0 }
 0x404   : > { %1363 = vadd.xlane.f32.xlu0 %v1362_v32 }
 0x46f   : > { %v1361_v41 = vpop.xlane.xlu1 %1360 }
 0x470   : > { %v1372_v42 = vmul.f32 %v3021_v9, %v1361_v41 }
 0x472   : > { %v1374_v43 = vsub.f32 %v1355_v27, %v1372_v42 }
 0x474   : > { %v1376_v10 = vmul.f32 %v1374_v43, %v1374_v43 }
 0x476   : > { %v1378_v44 = vsel %vm934_vm1, %v1376_v10, 0.0 }
 0x477   : > { %v1364_v33 = vpop.xlane.xlu0 %1363  ;;  %1379 = vadd.xlane.f32.xlu2 %v1378_v44 }
 0x478   : > { %v1373_v36 = vmul.f32 %v3021_v9, %v1364_v33 }
 0x47a   : > { %v1375_v45 = vsub.f32 %v1356_v31, %v1373_v36 }
 0x47c   : > { %v1377_v46 = vmul.f32 %v1375_v45, %v1375_v45 }
 0x47e   : > { %v1381_v47 = vsel %vm934_vm1, %v1377_v46, 0.0 }
 0x47f   : > { %1382 = vadd.xlane.f32.xlu1 %v1381_v47 }
 0x4ea   : > { %v1380_v49 = vpop.xlane.xlu2 %1379 }
 0x4eb   : > { %v1384_v50 = vmul.f32 %v1380_v49, %v3021_v9 }
 0x4ed   : > { %v1386_v52 = vadd.f32 1e-05, %v1384_v50 }
 0x4ef   : > { %2187 = vrsqrt.f32 %v1386_v52  ;;  %vm1394_vm11 = vweird.f32 %v1386_v52 }
 0x4f2   : > { %v1383_v53 = vpop.xlane.xlu1 %1382 }
 0x4f3   : > { %v1385_v55 = vmul.f32 %v1383_v53, %v3021_v9 }
 0x4f5   : > { %v2188_v56 = vpop.eup %2187  ;;  %v1387_v57 = vadd.f32 1e-05, %v1385_v55 }
 0x4f6   : > { %v1389_v59 = vmul.f32 %v2188_v56, %v1386_v52  ;;  %vm1395_vm10 = vweird.f32 %v2188_v56 }
 0x4f7   : > { %2189 = vrsqrt.f32 %v1387_v57  ;;  %vm1396_vm12 = vmor %vm1394_vm11, %vm1395_vm10  ;;  %vm1404_vm14 = vweird.f32 %v1387_v57 }
 0x4f8   : > { %v1390_v61 = vmul.f32 %v2188_v56, %v1389_v59 }
 0x4fa   : > { %v1391_v62 = vmul.f32 0.5, %v1390_v61 }
 0x4fc   : > { %v1392_v63 = vsub.f32 1.5, %v1391_v62 }
 0x4fd   : > { %v2190_v54 = vpop.eup %2189 }
 0x4fe   : > { %v1393_v0 = vmul.f32 %v2188_v56, %v1392_v63  ;;  %v1399_v58 = vmul.f32 %v2190_v54, %v1387_v57  ;;  %vm1405_vm13 = vweird.f32 %v2190_v54 }
 0x4ff   : > { %vm1406_vm15 = vmor %vm1404_vm14, %vm1405_vm13 }
 0x500   : > { %v1400_v3 = vmul.f32 %v2190_v54, %v1399_v58  ;;  %v1397_v4 = vsel %vm1396_vm12, %v2188_v56, %v1393_v0  ;;  %v2136_v58 = vld [vmem:[%s3235_s19] ss:$0 sm:$0xff] }
 0x501   : > { %v1408_v60 = vmul.f32 %v1397_v4, %v1374_v43 }
 0x502   : > { %v1401_v6 = vmul.f32 0.5, %v1400_v3 }
 0x503   : > { %v1413_v13 = vmul.f32 %v2131_v1, %v1408_v60 }
 0x504   : > { %v1402_v7 = vsub.f32 1.5, %v1401_v6 }
 0x505   : > { %v1418_v2 = vadd.f32 %v2132_v17, %v1413_v13 }
 0x506   : > { %v1403_v8 = vmul.f32 %v2190_v54, %v1402_v7 }
 0x508   : > { %v1407_v11 = vsel %vm1406_vm15, %v2190_v54, %v1403_v8  ;;  %v2135_v54 = vld [vmem:[%s897_s3] ss:$0 sm:$0xff] }
 0x509   : > { %v1409_v12 = vmul.f32 %v1407_v11, %v1375_v45 }
 0x50b   : > { %v1414_v18 = vmul.f32 %v2131_v1, %v1409_v12 }
 0x50d   : > { %v1419_v19 = vadd.f32 %v2132_v17, %v1414_v18 }
 0x50f   : > { %v1420_v15 = vpack.c.bf16 %v1419_v19, %v1418_v2 }
 0x511   : > { %1952 = vmatmul.msk.bf16.vlgmr.msra.gmra.mxu2 %vm934_vm1, %v1420_v15 }
 0x594   : > { %v1453_v21 = vpop.f32.mrf.mxu2 }
 0x595   : > { %v1454_v23 = vadd.f32 %v2133_v22, %v1453_v21 }
 0x597   : > { %v1458_v26 = vmax.f32 %v1454_v23, 0.0 }
 0x59c   : > { %v1455_v24 = vpop.f32.mrf.mxu2 }
 0x59d   : > { %v1456_v25 = vadd.f32 %v2133_v22, %v1455_v24 }
 0x59f   : > { %v1459_v27 = vmax.f32 %v1456_v25, 0.0 }
 0x5a1   : > { %v1460_v28 = vpack.c.bf16 %v1459_v27, %v1458_v26 }
 0x5a3   : > { %1969 = vmatmul.msk.bf16.vlgmr.msra.gmra.mxu3 %vm1497_vm0, %v1460_v28 }
 0x626   : > { %v1510_v30 = vpop.f32.mrf.mxu3 }
 0x627   : > { %v1511_v31 = vadd.f32 %v2134_v29, %v1510_v30 }
 0x629   : > { %v1515_v32 = vadd.f32 %v1511_v31, %v1418_v2 }
 0x62b   : > { %v1519_v34 = vsel %vm934_vm1, %v1515_v32, 0.0 }
 0x62c   : > { %1520 = vadd.xlane.f32.xlu0 %v1519_v34 }
 0x62e   : > { %v1512_v35 = vpop.f32.mrf.mxu3 }
 0x62f   : > { %v1513_v37 = vadd.f32 %v2134_v29, %v1512_v35 }
 0x631   : > { %v1516_v38 = vadd.f32 %v1513_v37, %v1419_v19 }
 0x633   : > { %v1522_v39 = vsel %vm934_vm1, %v1516_v38, 0.0 }
 0x634   : > { %1523 = vadd.xlane.f32.xlu2 %v1522_v39 }
 0x69f   : > { %v1521_v40 = vpop.xlane.xlu0 %1520 }
 0x6a0   : > { %v1525_v41 = vmul.f32 %v1521_v40, %v3021_v9 }
 0x6a2   : > { %v1527_v42 = vsub.f32 %v1515_v32, %v1525_v41 }
 0x6a4   : > { %v1529_v43 = vmul.f32 %v1527_v42, %v1527_v42 }
 0x6a6   : > { %v1531_v10 = vsel %vm934_vm1, %v1529_v43, 0.0 }
 0x6a7   : > { %v1524_v44 = vpop.xlane.xlu2 %1523  ;;  %1532 = vadd.xlane.f32.xlu1 %v1531_v10 }
 0x6a8   : > { %v1526_v33 = vmul.f32 %v1524_v44, %v3021_v9 }
 0x6aa   : > { %v1528_v36 = vsub.f32 %v1516_v38, %v1526_v33 }
 0x6ac   : > { %v1530_v45 = vmul.f32 %v1528_v36, %v1528_v36 }
 0x6ae   : > { %v1534_v46 = vsel %vm934_vm1, %v1530_v45, 0.0 }
 0x6af   : > { %1535 = vadd.xlane.f32.xlu0 %v1534_v46 }
 0x71a   : > { %v1533_v47 = vpop.xlane.xlu1 %1532 }
 0x71b   : > { %v1537_v48 = vmul.f32 %v1533_v47, %v3021_v9 }
 0x71d   : > { %v1539_v49 = vadd.f32 1e-05, %v1537_v48 }
 0x71f   : > { %2191 = vrsqrt.f32 %v1539_v49  ;;  %vm1547_vm4 = vweird.f32 %v1539_v49 }
 0x722   : > { %v1536_v50 = vpop.xlane.xlu0 %1535 }
 0x723   : > { %v1538_v51 = vmul.f32 %v1536_v50, %v3021_v9 }
 0x725   : > { %v2192_v52 = vpop.eup %2191  ;;  %v1540_v53 = vadd.f32 1e-05, %v1538_v51 }
 0x726   : > { %v1542_v55 = vmul.f32 %v2192_v52, %v1539_v49  ;;  %vm1548_vm3 = vweird.f32 %v2192_v52 }
 0x727   : > { %2193 = vrsqrt.f32 %v1540_v53  ;;  %vm1549_vm5 = vmor %vm1547_vm4, %vm1548_vm3  ;;  %vm1557_vm7 = vweird.f32 %v1540_v53 }
 0x728   : > { %v1543_v56 = vmul.f32 %v2192_v52, %v1542_v55 }
 0x72a   : > { %v1544_v57 = vmul.f32 0.5, %v1543_v56 }
 0x72c   : > { %v1545_v59 = vsub.f32 1.5, %v1544_v57 }
 0x72d   : > { %v2194_v61 = vpop.eup %2193 }
 0x72e   : > { %v1546_v62 = vmul.f32 %v2192_v52, %v1545_v59  ;;  %v1552_v63 = vmul.f32 %v2194_v61, %v1540_v53  ;;  %vm1558_vm6 = vweird.f32 %v2194_v61 }
 0x72f   : > { %vm1559_vm8 = vmor %vm1557_vm7, %vm1558_vm6 }
 0x730   : > { %v1550_v9 = vsel %vm1549_vm5, %v2192_v52, %v1546_v62  ;;  %v1553_v0 = vmul.f32 %v2194_v61, %v1552_v63 }
 0x731   : > { %v1561_v3 = vmul.f32 %v1550_v9, %v1527_v42 }
 0x732   : > { %v1554_v4 = vmul.f32 0.5, %v1553_v0 }
 0x733   : > { %v1566_v6 = vmul.f32 %v2135_v54, %v1561_v3 }
 0x734   : > { %v1555_v7 = vsub.f32 1.5, %v1554_v4 }
 0x735   : > { %v1571_v60 = vadd.f32 %v2136_v58, %v1566_v6 }
 0x736   : > { %v1556_v1 = vmul.f32 %v2194_v61, %v1555_v7 }
 0x737   : > { %1573 = vst.msk [vmem:[#allocation2] sm:$0xff] %vm934_vm1, %v1571_v60 }
 0x738   : > { %v1560_v8 = vsel %vm1559_vm8, %v2194_v61, %v1556_v1 }
 0x739   : > { %v1562_v11 = vmul.f32 %v1560_v8, %v1528_v36 }
 0x73b   : > { %v1567_v12 = vmul.f32 %v2135_v54, %v1562_v11  ;;  %1578 = sbr.rel (%p1970_p13) target bundleno = 2001 (0x7d1), region = 154 }
 0x73d   : > { %v1572_v13 = vadd.f32 %v2136_v58, %v1567_v12 }
 0x73f   : > { %1574 = vst.msk [vmem:[#allocation2 + $0x8] sm:$0xff] %vm934_vm1, %v1572_v13 }
 0x740   : > { %v1999_v17 = vld [vmem:[#allocation14 + $0x8] sm:$0xff]  ;;  %v1998_v18 = vld [vmem:[#allocation14] sm:$0xff]  ;;  %v1579_v2 = vpack.c.bf16 %v1572_v13, %v1571_v60 }
 0x741   : > { %1609 = vmatpush.bf16.msra.mxu0 %v1999_v17  ;;  %v2195_v19 = vld [vmem:[%s3237_s10] ss:$0 sm:$0xff] }
 0x745   : > { %1610 = vmatpush.bf16.msra.mxu0 %v1998_v18 }
 0x748   : > { %1979 = vmatmul.msk.bf16.vlgmr.msra.gmra.mxu0 %vm934_vm1, %v1579_v2 }
 0x7c5   : > { %v1612_v15 = vpop.f32.mrf.mxu0 }
 0x7c6   : > { %v1613_v14 = vadd.f32 %v2195_v19, %v1612_v15 }
 0x7c8   : > { %1617 = vst [vmem:[%s2883_s18] sm:$0xff] %v1613_v14 }
 0x7cd   : > { %v1614_v16 = vpop.f32.mrf.mxu0 }
 0x7ce   : > { %v1615_v5 = vadd.f32 %v2195_v19, %v1614_v16 }
 0x7d0   : > { %1618 = vst [vmem:[%s2883_s18 + $0x8] sm:$0xff] %v1615_v5 }
 0x7d1 PF: > { %s3238_s1 = sld [smem:[#allocation27_spill]]  ;;  %s1631_s20 = sshll.u32 %s2883_s18, 4  ;;  %s1632_s20 = int_to_ptr.vmem [resolvable:$true] %s1631_s20 }
 0x7d2   : > { %s3240_s6 = sld [smem:[#allocation53_spill]]  ;;  %s1620_s27 = scalar_lea.sflag [#allocation7], %s2805_s8 }
 0x7d7   : > { %s1981_s13 = sshll.u32 %s3238_s1, 3 }
 0x7d8   : > { %s1630_s12 = scalar_lea.hbm %s3240_s6, %s1981_s13  ;;  %s2386_s28 = scalar_lea.hbm %s3240_s6, 32 }
 0x7d9   : > { %s1633_s5 = sshll.u32 %s1630_s12, 4  ;;  %s1634_s5 = int_to_ptr.hbm [resolvable:$true] %s1633_s5 }
 0x7da   : > { %s2380_s0 = sshra.s32 %s1634_s5, 4  ;;  %s2381_s0 = int_to_ptr.hbm [resolvable:$true] %s2380_s0 }
 0x7db   : > { %s2382_s21 = scalar_lea.hbm %s2381_s0, 16  ;;  %p2387_p9 = scmp.lt.s32.totalorder %s2381_s0, %s3240_s6 }
 0x7dc   : > { %p2383_p5 = scmp.ne.s32.totalorder %s2381_s0, %s2382_s21  ;;  %p2388_p7 = scmp.lt.s32.totalorder %s2386_s28, %s2382_s21 }
 0x7de   : > { %p2384_p10 = pnand %p2383_p5, %p2725_p8  ;;  %p2389_p1 = por %p2388_p7, %p2387_p9 }
 0x7e0   : > { %p2385_p2 = pneg %p2384_p10 }
 0x7e2   : > { %p2390_p4 = pnand %p2389_p1, %p2385_p2 }
 0x7e4   : > { %2393 = shalt.err (!%p2390_p4)
}
 0x7e5   : > { %s2513_s8 = smov 128   ;;  %s2514_s18 = smov 256  }
 0x7e6   : > { %s2515_s30 = smov 8  }
 0x7e7   : > { %2014 = dma.vmem_to_hbm [thread:$0]  (%p2725_p8), %s1632_s20, 256, %s1634_s5, %s1620_s27, %s2513_s8, %s2514_s18, %s2515_s30  }
 0x7e8 PF: > { %s3241_s4 = sld [smem:[#allocation30_spill]] }
 0x7e9   : > { %s3242_s15 = sld [smem:[#allocation23_spill]] }
 0x7ee   : > { %p2026_p11 = scmp.ge.s32.totalorder %s3241_s4, 2 }
 0x7ef   : > { %s1648_s29 = sand.u32 1, %s3242_s15  }
 0x7f0   : > { %p2021_p12 = pnand %p2026_p11, %p2732_p3  ;;  %s1649_s9 = scalar_lea.sflag [#allocation7], %s1648_s29 }
 0x7f2   : > { %p2022_p0 = pneg %p2021_p12 }
 0x7f4   : > { %2455 = dma.done.wait (%p2022_p0), %s1649_s9, 256  }
 0x7f5   : > { %2457 = vsyncadd (%p2022_p0), %s1649_s9, 4294967040  ;;  %s39_s0 = sadd.s32 1, %s3241_s4   ;;  %s3244_s19 = sld [smem:[#allocation22_spill]] }
 0x7f6   : > { %p36_p6 = scmp.ge.s32.totalorder %s39_s0, 6   ;;  %s3245_s23 = sld [smem:[#allocation33_spill]] }
 0x7f7   : > { %s3246_s24 = sld [smem:[#allocation24_spill]]  ;;  %s3253_s21 = smov %s2464_s22 }
 0x7f8   : > { %s3247_s25 = sld [smem:[#allocation25_spill]] }
 0x7f9   : > { %s3248_s26 = sld [smem:[#allocation34_spill]]  ;;  %38 = sbr.rel (!%p36_p6) target bundleno = 32 (0x20), region = 260 }
 0x7fa   : > { %s3249_s27 = sld [smem:[#allocation28_spill]] }
 0x7fb   : > { %s3250_s28 = sld [smem:[#allocation29_spill]]  ;;  %s3254_s22 = smov %s3244_s19 }
 0x7fc   : > { %s3251_s29 = sld [smem:[#allocation31_spill]] }
 0x7fd   : > { %s3252_s30 = sld [smem:[#allocation32_spill]] }
 0x7fe   :  { %1655 = vsyncpa [#allocation6], 1 }
 0x7ff   :  { %1657 = vsyncpa [#allocation6 + $0x1], 1 }
 0x800   :  { %1658 = vsyncpa [#allocation9], 1 }
 0x801   :  { %1660 = vsyncpa [#allocation9 + $0x1], 1 }
 0x802   :  { %1661 = vsyncpa [#allocation12], 1 }
 0x803   :  { %1663 = vsyncpa [#allocation12 + $0x1], 1 }
 0x804   :  { %1664 = vsyncpa [#allocation15], 1 }
 0x805   :  { %1665 = vsyncpa [#allocation7], 1 }
 0x806   :  { %1667 = vsyncpa [#allocation7 + $0x1], 1 }

</bundles_post_ra>
